<compile_context>
chip_gen: v7x
topology: tpu7x:2x2x1
jax: 0.10.0
libtpu: 0.0.40
codegen_flags: <defaults>
</compile_context>

<pallas_src>
import numpy as np

import jax
import jax.numpy as jnp
from jax.experimental import pallas as pl
from jax.experimental.pallas import tpu as pltpu


# ----------------------------------------------------------------------------
# Module configuration (mirrors __init__ arguments of the PyTorch module).
# ----------------------------------------------------------------------------
DIM_U_INT = 4
DIM_U_SPL = 4
DIM_CT = 8
DIM_NCC = 8
DIM_BATCHEMB = 4
DIM_S = 16
DIM_Y = DIM_U_INT + DIM_U_SPL + DIM_CT + DIM_NCC + DIM_BATCHEMB  # 28

KWARGS_GENMODEL = {
    "dict_varname_to_dim": {
        "s": DIM_S,
        "CT": DIM_CT,
        "NCC": DIM_NCC,
        "cell-types": DIM_CT,
    }
}
ENCZ_HIDDEN = [32, 32]
ENCSIN_HIDDEN = [32, 32]
ENCSOUT_HIDDEN = [64, 32]
DICT_TAKE_CT_NCC = {
    "z": [True, False],
    "sin": [False, True],
    "sout": [True, True],
}


def _round_up(x, m):
    return ((x + m - 1) // m) * m


def _cdiv(a, b):
    return (a + b - 1) // b


def _dim_extension(varname):
    d = 0
    if DICT_TAKE_CT_NCC[varname][0]:
        d += KWARGS_GENMODEL["dict_varname_to_dim"]["CT"]
    if DICT_TAKE_CT_NCC[varname][1]:
        d += KWARGS_GENMODEL["dict_varname_to_dim"]["NCC"]
    return d


def _init_mlp_params(key, dim_input, list_dim_hidden, dim_output):
    """Deterministic Linear-layer init (uniform +-1/sqrt(fan_in), like torch)."""
    dims = [dim_input] + list(list_dim_hidden) + [dim_output]
    weights, biases = [], []
    for i in range(len(dims) - 1):
        key, kw, kb = jax.random.split(key, 3)
        bound = 1.0 / jnp.sqrt(jnp.float32(dims[i]))
        w = jax.random.uniform(
            kw, (dims[i], dims[i + 1]), jnp.float32, minval=-bound, maxval=bound
        )
        b = jax.random.uniform(
            kb, (1, dims[i + 1]), jnp.float32, minval=-bound, maxval=bound
        )
        weights.append(w)
        biases.append(b)
    return weights, biases


# ----------------------------------------------------------------------------
# Fused-parameter construction (host-side, init-time glue).
# Output-column layout of every fused layer: [z-block | sin-block | sout-block],
# padded to 128 lanes on hidden layers, exact width (48) on the final layer.
# ----------------------------------------------------------------------------
def _place_layer0(varname, w, col0, w0_int, w0_spl, w0_y):
    """Scatter MLP `varname`'s first-layer weight rows into the fused layer-0
    row-blocks (xbar_int / xbar_spl / batch.y), folding the CT/NCC selection."""
    ct0 = DIM_U_INT + DIM_U_SPL
    ncc0 = ct0 + DIM_CT
    h = w.shape[1]
    r = 0
    if varname == "z":
        w0_int[:, col0:col0 + h] = w[r:r + DIM_S, :]; r += DIM_S
    elif varname == "sin":
        w0_spl[:, col0:col0 + h] = w[r:r + DIM_S, :]; r += DIM_S
    else:  # "sout": input = [xbar_int | xbar_spl | ...]
        w0_int[:, col0:col0 + h] = w[r:r + DIM_S, :]; r += DIM_S
        w0_spl[:, col0:col0 + h] = w[r:r + DIM_S, :]; r += DIM_S
    if DICT_TAKE_CT_NCC[varname][0]:
        w0_y[ct0:ct0 + DIM_CT, col0:col0 + h] = w[r:r + DIM_CT, :]; r += DIM_CT
    if DICT_TAKE_CT_NCC[varname][1]:
        w0_y[ncc0:ncc0 + DIM_NCC, col0:col0 + h] = w[r:r + DIM_NCC, :]; r += DIM_NCC
    assert r == w.shape[0]


def build_fused_params(params_z, params_sin, params_sout):
    wz, bz = params_z
    wsn, bsn = params_sin
    wso, bso = params_sout
    n_layers = len(wz)
    # TODO(synk): unequal-depth MLP fusion would need identity passthrough blocks.
    assert len(wsn) == n_layers and len(wso) == n_layers, "fusion needs equal depth"

    def np32(a):
        return np.asarray(a, dtype=np.float32)

    def lane_width(tot, is_last):
        # Hidden layers: lane-dense 128 for the MXU.  Final layer: exact width
        # (48) so the output HBM store only carries useful bytes.
        return tot if is_last else _round_up(tot, 128)

    # --- layer 0: fold CT/NCC selection + concat glue into the weights ---
    hz, hs, ho = wz[0].shape[1], wsn[0].shape[1], wso[0].shape[1]
    tot = hz + hs + ho
    w_lane = lane_width(tot, n_layers == 1)
    w0_int = np.zeros((DIM_S, w_lane), np.float32)
    w0_spl = np.zeros((DIM_S, w_lane), np.float32)
    w0_y = np.zeros((DIM_Y, w_lane), np.float32)
    b0 = np.zeros((1, w_lane), np.float32)

    _place_layer0("z", np32(wz[0]), 0, w0_int, w0_spl, w0_y)
    _place_layer0("sin", np32(wsn[0]), hz, w0_int, w0_spl, w0_y)
    _place_layer0("sout", np32(wso[0]), hz + hs, w0_int, w0_spl, w0_y)
    b0[0, 0:hz] = np32(bz[0])[0]
    b0[0, hz:hz + hs] = np32(bsn[0])[0]
    b0[0, hz + hs:tot] = np32(bso[0])[0]

    # --- layers >= 1: block-diagonal ---
    layers = []
    prev = (hz, hs, ho, w_lane)
    for l in range(1, n_layers):
        phz, phs, pho, p_lane = prev
        hz, hs, ho = wz[l].shape[1], wsn[l].shape[1], wso[l].shape[1]
        tot = hz + hs + ho
        w_lane = lane_width(tot, l == n_layers - 1)
        w = np.zeros((p_lane, w_lane), np.float32)
        b = np.zeros((1, w_lane), np.float32)
        w[0:phz, 0:hz] = np32(wz[l])
        w[phz:phz + phs, hz:hz + hs] = np32(wsn[l])
        w[phz + phs:phz + phs + pho, hz + hs:tot] = np32(wso[l])
        b[0, 0:hz] = np32(bz[l])[0]
        b[0, hz:hz + hs] = np32(bsn[l])[0]
        b[0, hz + hs:tot] = np32(bso[l])[0]
        layers.append((jnp.asarray(w), jnp.asarray(b)))
        prev = (hz, hs, ho, w_lane)

    return dict(
        w0_int=jnp.asarray(w0_int),
        w0_spl=jnp.asarray(w0_spl),
        w0_y=jnp.asarray(w0_y),
        b0=jnp.asarray(b0),
        layers=layers,
        out_slices=(prev[0], prev[1], prev[2]),   # final (d_z, d_sin, d_sout)
        out_width=prev[3],                        # exact output width (48)
        n_layers=n_layers,
    )


# ----------------------------------------------------------------------------
# Fused Pallas kernel: all three MLPs, all layers, in one launch.
# ----------------------------------------------------------------------------
def _make_fused_kernel(n_layers):
    def kernel(*refs):
        # refs = (x_int, x_spl, y, w0_int, w0_spl, w0_y, b0, w1, b1, ..., out)
        xi_ref, xs_ref, y_ref = refs[0], refs[1], refs[2]
        out_ref = refs[-1]
        p = refs[3:-1]
        # Layer 0: three row-block weights (xbar_int / xbar_spl / batch.y) summed.
        # TODO(synk): if the producer can hand one pre-packed [N, 64] slab, this
        # collapses to a single matmul (do NOT concat in the wrapper, though).
        h = (
            jnp.dot(xi_ref[...], p[0][...], preferred_element_type=jnp.float32)
            + jnp.dot(xs_ref[...], p[1][...], preferred_element_type=jnp.float32)
            + jnp.dot(y_ref[...], p[2][...], preferred_element_type=jnp.float32)
            + p[3][...]
        )
        # Remaining layers: ReLU between layers only (no ReLU after the last).
        for l in range(1, n_layers):
            h = jnp.maximum(h, 0.0)
            w_ref = p[4 + 2 * (l - 1)]
            b_ref = p[5 + 2 * (l - 1)]
            h = jnp.dot(h, w_ref[...], preferred_element_type=jnp.float32) + b_ref[...]
        out_ref[...] = h.astype(out_ref.dtype)

    return kernel


# ----------------------------------------------------------------------------
# Generation-aware row-tile heuristic.
# ----------------------------------------------------------------------------
_MAX_TILE_ROWS = 2048  # per-step working set at 2048 rows is only a few MB


def _tensorcores_per_device():
    """2 for megacore chips (v4 / v5p / v7x), 1 for v5e / v6e.  Defaults to 1
    (single tile) if detection fails — still correct, just no core split."""
    try:
        kind = jax.devices()[0].device_kind.lower()
    except Exception:
        return 1
    if any(t in kind for t in ("lite", "v5e", "v6e", "v6")):
        return 1
    if any(t in kind for t in ("v4", "v5p", "v7", "7x")):
        return 2
    return 1


def _pick_tile_n(n, n_cores):
    if n <= 8:
        return 8
    if n_cores <= 1:
        # Single TensorCore: grid is a sequential loop — one step unless the
        # batch exceeds the VMEM-safe tile cap.
        steps = _cdiv(n, _MAX_TILE_ROWS)
    else:
        # Megacore: even number of roughly-equal steps so both TCs stay busy.
        steps = max(2, 2 * _cdiv(n, 2 * _MAX_TILE_ROWS))
    return max(8, _round_up(_cdiv(n, steps), 8))


def fused_mlps_pallas(xbar_int, xbar_spl, batch_y, fused, *, tile_n=None):
    n = xbar_int.shape[0]
    d_int, d_spl, d_y = xbar_int.shape[1], xbar_spl.shape[1], batch_y.shape[1]
    d_out = fused["out_width"]
    n_layers = fused["n_layers"]

    if tile_n is None:
        tile_n = _pick_tile_n(n, _tensorcores_per_device())
    tile_n = max(8, _round_up(tile_n, 8))

    flat_params = [fused["w0_int"], fused["w0_spl"], fused["w0_y"], fused["b0"]]
    for w, b in fused["layers"]:
        flat_params.extend([w, b])

    in_specs = [
        pl.BlockSpec((tile_n, d_int), lambda i: (i, 0)),
        pl.BlockSpec((tile_n, d_spl), lambda i: (i, 0)),
        pl.BlockSpec((tile_n, d_y), lambda i: (i, 0)),
    ]
    for prm in flat_params:
        # Weights / biases: small, full blocks, constant across the grid
        # (Pallas skips the re-DMA when the block index does not change).
        in_specs.append(pl.BlockSpec(prm.shape, lambda i: (0, 0)))

    out_spec = pl.BlockSpec((tile_n, d_out), lambda i: (i, 0))  # exact 48 lanes

    # No padding / slicing: the ragged last block is handled by Pallas (reads
    # past N are garbage rows that only feed matmul/ReLU; writes are masked).
    return pl.pallas_call(
        _make_fused_kernel(n_layers),
        out_shape=jax.ShapeDtypeStruct((n, d_out), jnp.float32),
        grid_spec=pltpu.PrefetchScalarGridSpec(
            num_scalar_prefetch=0,
            grid=(pl.cdiv(n, tile_n),),
            in_specs=in_specs,
            out_specs=out_spec,
        ),
        compiler_params=pltpu.CompilerParams(
            dimension_semantics=("parallel",),
        ),
    )(xbar_int, xbar_spl, batch_y, *flat_params)


# ----------------------------------------------------------------------------
# Module forward (matches Cond4FlowVarphi0SimpleMLPs.forward semantics).
# ----------------------------------------------------------------------------
def cond4flow_forward(fused, ten_xbar_int, batch_y, ten_xbar_spl, ten_xy_absolute,
                      *, tile_n=None):
    """ten_xy_absolute is unused in the reference forward (kept for parity)."""
    del ten_xy_absolute
    assert batch_y.shape[1] == DIM_Y
    out = fused_mlps_pallas(ten_xbar_int, ten_xbar_spl, batch_y, fused, tile_n=tile_n)
    dz, dsin, dsout = fused["out_slices"]
    # Packed [N, 48] slab -> three heads (tiny slice copies; a consumer that
    # accepts the packed slab directly would avoid even these).
    mu_z = out[:, 0:dz]
    mu_sin = out[:, dz:dz + dsin]
    mu_sout = out[:, dz + dsin:dz + dsin + dsout]
    sigma_sz = 1e-4 * jnp.ones((dz + dsin,), jnp.float32)
    return dict(mu_z=mu_z, mu_sin=mu_sin, mu_sout=mu_sout, sigma_sz=sigma_sz)


# ----------------------------------------------------------------------------
# Pure-JAX reference (unfused) for correctness check.
# ----------------------------------------------------------------------------
def _mlp_ref(x, weights, biases):
    h = x
    for l, (w, b) in enumerate(zip(weights, biases)):
        h = h @ w + b
        if l < len(weights) - 1:
            h = jnp.maximum(h, 0.0)
    return h


def _extend_by_ct_ncc_ref(x, y, varname):
    out = [x]
    base = DIM_U_INT + DIM_U_SPL
    if DICT_TAKE_CT_NCC[varname][0]:
        out.append(y[:, base:base + DIM_CT])
    if DICT_TAKE_CT_NCC[varname][1]:
        out.append(y[:, base + DIM_CT:base + DIM_CT + DIM_NCC])
    return jnp.concatenate(out, axis=1) if len(out) > 1 else out[0]


if __name__ == "__main__":
    key = jax.random.PRNGKey(0)

    # Parameters (deterministic, synthetic).
    k1, k2, k3, kd = jax.random.split(key, 4)
    params_z = _init_mlp_params(k1, DIM_S + _dim_extension("z"), ENCZ_HIDDEN, DIM_S)
    params_sin = _init_mlp_params(k2, DIM_S + _dim_extension("sin"), ENCSIN_HIDDEN, DIM_S)
    params_sout = _init_mlp_params(
        k3, 2 * DIM_S + _dim_extension("sout"), ENCSOUT_HIDDEN, DIM_S
    )
    fused = build_fused_params(params_z, params_sin, params_sout)

    # Inputs: N cells, [N, D] layout.
    N = 200
    kx1, kx2, ky, kxy = jax.random.split(kd, 4)
    ten_xbar_int = jax.random.normal(kx1, (N, DIM_S), jnp.float32)
    ten_xbar_spl = jax.random.normal(kx2, (N, DIM_S), jnp.float32)
    batch_y = jax.random.normal(ky, (N, DIM_Y), jnp.float32)
    ten_xy_absolute = jax.random.normal(kxy, (N, 2), jnp.float32)

    # Reference (unfused pure JAX).
    ref_z = _mlp_ref(_extend_by_ct_ncc_ref(ten_xbar_int, batch_y, "z"), *params_z)
    ref_sin = _mlp_ref(_extend_by_ct_ncc_ref(ten_xbar_spl, batch_y, "sin"), *params_sin)
    ref_sout = _mlp_ref(
        _extend_by_ct_ncc_ref(
            jnp.concatenate([ten_xbar_int, ten_xbar_spl], axis=1), batch_y, "sout"
        ),
        *params_sout,
    )

    def check(out):
        assert out["mu_z"].shape == (N, DIM_S)
        assert out["mu_sin"].shape == (N, DIM_S)
        assert out["mu_sout"].shape == (N, DIM_S)
        assert jnp.allclose(out["mu_z"], ref_z, atol=1e-4, rtol=1e-4)
        assert jnp.allclose(out["mu_sin"], ref_sin, atol=1e-4, rtol=1e-4)
        assert jnp.allclose(out["mu_sout"], ref_sout, atol=1e-4, rtol=1e-4)
        assert out["sigma_sz"].shape == (2 * DIM_S,)
        assert jnp.allclose(out["sigma_sz"], 1e-4)

    # 1) default generation-aware tiling
    out = cond4flow_forward(fused, ten_xbar_int, batch_y, ten_xbar_spl, ten_xy_absolute)
    jax.block_until_ready(out)
    check(out)

    # 2) explicit small tile -> multi-step grid with a ragged last block
    out_ragged = cond4flow_forward(
        fused, ten_xbar_int, batch_y, ten_xbar_spl, ten_xy_absolute, tile_n=64
    )
    jax.block_until_ready(out_ragged)
    check(out_ragged)

    print("KERNEL_OK")
</pallas_src>

<mosaic_0001>
module attributes {stable_mosaic.version = 11 : i64} {
  func.func @kernel(%arg0: i32, %arg1: memref<200x16xf32, #tpu.memory_space<vmem>>, %arg2: memref<200x16xf32, #tpu.memory_space<vmem>>, %arg3: memref<200x28xf32, #tpu.memory_space<vmem>>, %arg4: memref<16x128xf32, #tpu.memory_space<vmem>>, %arg5: memref<16x128xf32, #tpu.memory_space<vmem>>, %arg6: memref<28x128xf32, #tpu.memory_space<vmem>>, %arg7: memref<1x128xf32, #tpu.memory_space<vmem>>, %arg8: memref<128x128xf32, #tpu.memory_space<vmem>>, %arg9: memref<1x128xf32, #tpu.memory_space<vmem>>, %arg10: memref<128x48xf32, #tpu.memory_space<vmem>>, %arg11: memref<1x48xf32, #tpu.memory_space<vmem>>, %arg12: memref<200x48xf32, #tpu.memory_space<vmem>>) attributes {dimension_semantics = [#tpu.dimension_semantics<parallel>], iteration_bounds = array<i64: 1>, scalar_prefetch = 0 : i64, scratch_operands = 0 : i64, tpu.core_type = #tpu.core_type<tc>, window_params = [{transform_indices = @transform_0, window_bounds = array<i64: 200, 16>}, {transform_indices = @transform_1, window_bounds = array<i64: 200, 16>}, {transform_indices = @transform_2, window_bounds = array<i64: 200, 28>}, {pipeline_mode = #tpu.pipeline_mode<synchronous>, transform_indices = @transform_3, window_bounds = array<i64: 16, 128>}, {pipeline_mode = #tpu.pipeline_mode<synchronous>, transform_indices = @transform_4, window_bounds = array<i64: 16, 128>}, {pipeline_mode = #tpu.pipeline_mode<synchronous>, transform_indices = @transform_5, window_bounds = array<i64: 28, 128>}, {pipeline_mode = #tpu.pipeline_mode<synchronous>, transform_indices = @transform_6, window_bounds = array<i64: 1, 128>}, {pipeline_mode = #tpu.pipeline_mode<synchronous>, transform_indices = @transform_7, window_bounds = array<i64: 128, 128>}, {pipeline_mode = #tpu.pipeline_mode<synchronous>, transform_indices = @transform_8, window_bounds = array<i64: 1, 128>}, {pipeline_mode = #tpu.pipeline_mode<synchronous>, transform_indices = @transform_9, window_bounds = array<i64: 128, 48>}, {pipeline_mode = #tpu.pipeline_mode<synchronous>, transform_indices = @transform_10, window_bounds = array<i64: 1, 48>}, {transform_indices = @transform_11, window_bounds = array<i64: 200, 48>}]} {
    %c0 = arith.constant 0 : index
    %c0_0 = arith.constant 0 : index
    %0 = vector.load %arg1[%c0, %c0_0] : memref<200x16xf32, #tpu.memory_space<vmem>>, vector<200x16xf32>
    %c0_1 = arith.constant 0 : index
    %c0_2 = arith.constant 0 : index
    %1 = vector.load %arg4[%c0_1, %c0_2] : memref<16x128xf32, #tpu.memory_space<vmem>>, vector<16x128xf32>
    %cst = arith.constant dense<0.000000e+00> : vector<200x128xf32>
    %2 = tpu.matmul %0, %1, %cst {dimension_numbers = #tpu.dot_dimension_numbers<[1], [0], [0], [1], [0, 0, 1, 1], [], []>} : vector<200x16xf32>, vector<16x128xf32>, vector<200x128xf32> -> vector<200x128xf32>
    %c0_3 = arith.constant 0 : index
    %c0_4 = arith.constant 0 : index
    %3 = vector.load %arg2[%c0_3, %c0_4] : memref<200x16xf32, #tpu.memory_space<vmem>>, vector<200x16xf32>
    %c0_5 = arith.constant 0 : index
    %c0_6 = arith.constant 0 : index
    %4 = vector.load %arg5[%c0_5, %c0_6] : memref<16x128xf32, #tpu.memory_space<vmem>>, vector<16x128xf32>
    %cst_7 = arith.constant dense<0.000000e+00> : vector<200x128xf32>
    %5 = tpu.matmul %3, %4, %cst_7 {dimension_numbers = #tpu.dot_dimension_numbers<[1], [0], [0], [1], [0, 0, 1, 1], [], []>} : vector<200x16xf32>, vector<16x128xf32>, vector<200x128xf32> -> vector<200x128xf32>
    %6 = arith.addf %2, %5 : vector<200x128xf32>
    %c0_8 = arith.constant 0 : index
    %c0_9 = arith.constant 0 : index
    %7 = vector.load %arg3[%c0_8, %c0_9] : memref<200x28xf32, #tpu.memory_space<vmem>>, vector<200x28xf32>
    %c0_10 = arith.constant 0 : index
    %c0_11 = arith.constant 0 : index
    %8 = vector.load %arg6[%c0_10, %c0_11] : memref<28x128xf32, #tpu.memory_space<vmem>>, vector<28x128xf32>
    %cst_12 = arith.constant dense<0.000000e+00> : vector<200x128xf32>
    %9 = tpu.matmul %7, %8, %cst_12 {dimension_numbers = #tpu.dot_dimension_numbers<[1], [0], [0], [1], [0, 0, 1, 1], [], []>} : vector<200x28xf32>, vector<28x128xf32>, vector<200x128xf32> -> vector<200x128xf32>
    %10 = arith.addf %6, %9 : vector<200x128xf32>
    %c0_13 = arith.constant 0 : index
    %c0_14 = arith.constant 0 : index
    %11 = vector.load %arg7[%c0_13, %c0_14] : memref<1x128xf32, #tpu.memory_space<vmem>>, vector<1x128xf32>
    %12 = vector.broadcast %11 : vector<1x128xf32> to vector<200x128xf32>
    %13 = arith.addf %10, %12 : vector<200x128xf32>
    %cst_15 = arith.constant 0.000000e+00 : f32
    %14 = vector.broadcast %cst_15 : f32 to vector<200x128xf32>
    %15 = arith.maximumf %13, %14 : vector<200x128xf32>
    %c0_16 = arith.constant 0 : index
    %c0_17 = arith.constant 0 : index
    %16 = vector.load %arg8[%c0_16, %c0_17] : memref<128x128xf32, #tpu.memory_space<vmem>>, vector<128x128xf32>
    %cst_18 = arith.constant dense<0.000000e+00> : vector<200x128xf32>
    %17 = tpu.matmul %15, %16, %cst_18 {dimension_numbers = #tpu.dot_dimension_numbers<[1], [0], [0], [1], [0, 0, 1, 1], [], []>} : vector<200x128xf32>, vector<128x128xf32>, vector<200x128xf32> -> vector<200x128xf32>
    %c0_19 = arith.constant 0 : index
    %c0_20 = arith.constant 0 : index
    %18 = vector.load %arg9[%c0_19, %c0_20] : memref<1x128xf32, #tpu.memory_space<vmem>>, vector<1x128xf32>
    %19 = vector.broadcast %18 : vector<1x128xf32> to vector<200x128xf32>
    %20 = arith.addf %17, %19 : vector<200x128xf32>
    %cst_21 = arith.constant 0.000000e+00 : f32
    %21 = vector.broadcast %cst_21 : f32 to vector<200x128xf32>
    %22 = arith.maximumf %20, %21 : vector<200x128xf32>
    %c0_22 = arith.constant 0 : index
    %c0_23 = arith.constant 0 : index
    %23 = vector.load %arg10[%c0_22, %c0_23] : memref<128x48xf32, #tpu.memory_space<vmem>>, vector<128x48xf32>
    %cst_24 = arith.constant dense<0.000000e+00> : vector<200x48xf32>
    %24 = tpu.matmul %22, %23, %cst_24 {dimension_numbers = #tpu.dot_dimension_numbers<[1], [0], [0], [1], [0, 0, 1, 1], [], []>} : vector<200x128xf32>, vector<128x48xf32>, vector<200x48xf32> -> vector<200x48xf32>
    %c0_25 = arith.constant 0 : index
    %c0_26 = arith.constant 0 : index
    %25 = vector.load %arg11[%c0_25, %c0_26] : memref<1x48xf32, #tpu.memory_space<vmem>>, vector<1x48xf32>
    %26 = vector.broadcast %25 : vector<1x48xf32> to vector<200x48xf32>
    %27 = arith.addf %24, %26 : vector<200x48xf32>
    %c0_27 = arith.constant 0 : index
    %c0_28 = arith.constant 0 : index
    %28 = vector.load %arg12[%c0_27, %c0_28] : memref<200x48xf32, #tpu.memory_space<vmem>>, vector<200x48xf32>
    tpu.vector_store %arg12[%c0_27, %c0_28], %27 {strides = array<i32>} : memref<200x48xf32, #tpu.memory_space<vmem>>, vector<200x48xf32>,
    return
  }
  func.func @transform_0(%arg0: i32) -> (i32, i32) {
    %c0_i32 = arith.constant 0 : i32
    %c0_i32_0 = arith.constant 0 : i32
    return %arg0, %c0_i32 : i32, i32
  }
  func.func @transform_1(%arg0: i32) -> (i32, i32) {
    %c0_i32 = arith.constant 0 : i32
    %c0_i32_0 = arith.constant 0 : i32
    return %arg0, %c0_i32 : i32, i32
  }
  func.func @transform_2(%arg0: i32) -> (i32, i32) {
    %c0_i32 = arith.constant 0 : i32
    %c0_i32_0 = arith.constant 0 : i32
    return %arg0, %c0_i32 : i32, i32
  }
  func.func @transform_3(%arg0: i32) -> (i32, i32) {
    %c0_i32 = arith.constant 0 : i32
    %c0_i32_0 = arith.constant 0 : i32
    %c0_i32_1 = arith.constant 0 : i32
    return %c0_i32, %c0_i32_0 : i32, i32
  }
  func.func @transform_4(%arg0: i32) -> (i32, i32) {
    %c0_i32 = arith.constant 0 : i32
    %c0_i32_0 = arith.constant 0 : i32
    %c0_i32_1 = arith.constant 0 : i32
    return %c0_i32, %c0_i32_0 : i32, i32
  }
  func.func @transform_5(%arg0: i32) -> (i32, i32) {
    %c0_i32 = arith.constant 0 : i32
    %c0_i32_0 = arith.constant 0 : i32
    %c0_i32_1 = arith.constant 0 : i32
    return %c0_i32, %c0_i32_0 : i32, i32
  }
  func.func @transform_6(%arg0: i32) -> (i32, i32) {
    %c0_i32 = arith.constant 0 : i32
    %c0_i32_0 = arith.constant 0 : i32
    %c0_i32_1 = arith.constant 0 : i32
    return %c0_i32, %c0_i32_0 : i32, i32
  }
  func.func @transform_7(%arg0: i32) -> (i32, i32) {
    %c0_i32 = arith.constant 0 : i32
    %c0_i32_0 = arith.constant 0 : i32
    %c0_i32_1 = arith.constant 0 : i32
    return %c0_i32, %c0_i32_0 : i32, i32
  }
  func.func @transform_8(%arg0: i32) -> (i32, i32) {
    %c0_i32 = arith.constant 0 : i32
    %c0_i32_0 = arith.constant 0 : i32
    %c0_i32_1 = arith.constant 0 : i32
    return %c0_i32, %c0_i32_0 : i32, i32
  }
  func.func @transform_9(%arg0: i32) -> (i32, i32) {
    %c0_i32 = arith.constant 0 : i32
    %c0_i32_0 = arith.constant 0 : i32
    %c0_i32_1 = arith.constant 0 : i32
    return %c0_i32, %c0_i32_0 : i32, i32
  }
  func.func @transform_10(%arg0: i32) -> (i32, i32) {
    %c0_i32 = arith.constant 0 : i32
    %c0_i32_0 = arith.constant 0 : i32
    %c0_i32_1 = arith.constant 0 : i32
    return %c0_i32, %c0_i32_0 : i32, i32
  }
  func.func @transform_11(%arg0: i32) -> (i32, i32) {
    %c0_i32 = arith.constant 0 : i32
    %c0_i32_0 = arith.constant 0 : i32
    return %arg0, %c0_i32 : i32, i32
  }
}

</mosaic_0001>

<bundles_post_ra>
// kernel: tpu_custom_call.1
= control target key start
LH: loop header
LB: loop body
LE: loop exit
PB: predicated region body
PF: predicated region fallthrough
CT: control target
= control target key end

     0   :  { %v2251_v0 = vmov 0.0|0.0   ;;  %vm2252_vm0 = vmmov 0   ;;  %v2253_v4 = vmov 0.0   ;;  %vm92_vm1 = vcmask 130048   ;;  %s3271_s4 = inlined_call_operand.vmem [shape: f32[16,128], index: 4, kind: input, shape index: {}]   ;;  %s3272_s5 = inlined_call_operand.vmem [shape: f32[28,128], index: 5, kind: input, shape index: {}]   ;;  %s3273_s3 = inlined_call_operand.vmem [shape: f32[16,128], index: 3, kind: input, shape index: {}]   ;;  %s3274_s1 = inlined_call_operand.vmem [shape: f32[200,16], index: 1, kind: input, shape index: {}]   ;;  %s3275_s7 = inlined_call_operand.vmem [shape: f32[128,128], index: 7, kind: input, shape index: {}]   ;;  %s3276_s0 = inlined_call_operand.vmem [shape: f32[200,16], index: 0, kind: input, shape index: {}]   ;;  %s3277_s2 = inlined_call_operand.vmem [shape: f32[200,28], index: 2, kind: input, shape index: {}]   ;;  %s3278_s9 = inlined_call_operand.vmem [shape: f32[128,48], index: 9, kind: input, shape index: {}]   ;;  %s3279_s6 = inlined_call_operand.vmem [shape: f32[1,128], index: 6, kind: input, shape index: {}]   ;;  %s3280_s8 = inlined_call_operand.vmem [shape: f32[1,128], index: 8, kind: input, shape index: {}]   ;;  %s3281_s10 = inlined_call_operand.vmem [shape: f32[1,48], index: 10, kind: input, shape index: {}]   ;;  %s3282_s11 = inlined_call_operand.vmem [shape: f32[200,48], index: 11, kind: output, shape index: {}]  }
   0x1   :  { %2184 = vmatprep.subr.bf16.mxu0 %v2251_v0  ;;  %2245 = vmatprep.subr.bf16.mxu1 %v2251_v0  ;;  %v90_v1 = vld [vmem:[%s3271_s4] sm:$0xff]  ;;  %v91_v2 = vld [vmem:[%s3271_s4 + $0x8] sm:$0xff]  ;;  %v650_v13 = vld [vmem:[%s3272_s5 + $0x10] sm:$0xff]  ;;  %vm728_vm2 = vcmask 1043456   ;;  %vm2254_vm3 = vmmov 1   ;;  %vm652_vm5 = vcmask 228352  }
   0x2   :  { %v2185_v3 = vpack.c.bf16 %v91_v2, %v90_v1  ;;  %1733 = vmatprep.mubr.msk.f32.mxu0 %vm2252_vm0, %v2253_v4  ;;  %1772 = vmatprep.mubr.msk.f32.mxu1 %vm2252_vm0, %v2253_v4  ;;  %v648_v5 = vld [vmem:[%s3272_s5] sm:$0xff]  ;;  %v649_v6 = vld [vmem:[%s3272_s5 + $0x8] sm:$0xff]  ;;  %v79_v15 = vld [vmem:[%s3274_s1 + $0x70] sm:$0xff]  ;;  %vm1455_vm6 = vcmask 392192  }
   0x3   :  { %v63_v7 = vld [vmem:[%s3273_s3] sm:$0xff]  ;;  %v64_v8 = vld [vmem:[%s3273_s3 + $0x8] sm:$0xff]  ;;  %v2191_v11 = vpack.c.bf16 %v649_v6, %v648_v5  ;;  %v651_v16 = vld [vmem:[%s3272_s5 + $0x18] sm:$0xf] }
   0x4   :  { %2186 = vmatpush3.bf16.msra.mxu0 %v2185_v3  ;;  %2246 = vmatpush3.bf16.msra.mxu1 %v2185_v3  ;;  %v65_v9 = vld [vmem:[%s3274_s1] sm:$0xff]  ;;  %v78_v10 = vld [vmem:[%s3274_s1 + $0x68] sm:$0xff]  ;;  %v2188_v12 = vpack.c.bf16 %v64_v8, %v63_v7  ;;  %v2194_v17 = vpack.c.bf16 %v651_v16, %v650_v13  ;;  %vm2195_vm4 = vmpackc.low %vm728_vm2, %vm2254_vm3 }
   0x5   :  { %2190 = vmatprep.subr.bf16.mxu0 %v2251_v0  ;;  %2187 = vmatprep.subr.bf16.mxu1 %v2251_v0  ;;  %v66_v14 = vld [vmem:[%s3274_s1 + $0x8] sm:$0xff]  ;;  %v67_v18 = vld [vmem:[%s3274_s1 + $0x10] sm:$0xff]  ;;  %v80_v19 = vld [vmem:[%s3274_s1 + $0x78] sm:$0xff] }
   0x6   :  { %v68_v20 = vld [vmem:[%s3274_s1 + $0x18] sm:$0xff]  ;;  %v81_v21 = vld [vmem:[%s3274_s1 + $0x80] sm:$0xff]  ;;  %v82_v23 = vld [vmem:[%s3274_s1 + $0x88] sm:$0xff] }
   0x7   :  { %1734 = vmatmul.mubr.msk.f32.vlgmr.msra.gmra.mrb[0].mxu0 %vm92_vm1, %v65_v9  ;;  %1773 = vmatmul.mubr.msk.f32.vlgmr.msra.gmra.mrb[0].mxu1 %vm92_vm1, %v78_v10  ;;  %v69_v22 = vld [vmem:[%s3274_s1 + $0x20] sm:$0xff]  ;;  %v70_v24 = vld [vmem:[%s3274_s1 + $0x28] sm:$0xff]  ;;  %v83_v25 = vld [vmem:[%s3274_s1 + $0x90] sm:$0xff] }
   0x8   :  { %2192 = vmatpush3.bf16.msra.mxu0 %v2191_v11  ;;  %1736 = vmatprep.mubr.msk.f32.mxu0 %vm2252_vm0, %v2253_v4  ;;  %v71_v26 = vld [vmem:[%s3274_s1 + $0x30] sm:$0xff]  ;;  %v84_v27 = vld [vmem:[%s3274_s1 + $0x98] sm:$0xff]  ;;  %v85_v29 = vld [vmem:[%s3274_s1 + $0xa0] sm:$0xff] }
   0x9   :  { %1775 = vmatprep.mubr.msk.f32.mxu1 %vm2252_vm0, %v2253_v4  ;;  %2189 = vmatpush3.bf16.msra.mxu1 %v2188_v12  ;;  %v72_v28 = vld [vmem:[%s3274_s1 + $0x38] sm:$0xff]  ;;  %v73_v30 = vld [vmem:[%s3274_s1 + $0x40] sm:$0xff]  ;;  %v86_v31 = vld [vmem:[%s3274_s1 + $0xa8] sm:$0xff] }
   0xa   :  { %2193 = vmatprep.subr.bf16.mxu0 %v2251_v0  ;;  %2197 = vmatprep.subr.bf16.mxu1 %v2251_v0  ;;  %v74_v32 = vld [vmem:[%s3274_s1 + $0x48] sm:$0xff]  ;;  %v87_v33 = vld [vmem:[%s3274_s1 + $0xb0] sm:$0xff]  ;;  %v88_v35 = vld [vmem:[%s3274_s1 + $0xb8] sm:$0xff] }
   0xb   :  { %1737 = vmatmul.mubr.msk.f32.gmra.mrb[2].mxu0 %vm92_vm1, %v66_v14  ;;  %1776 = vmatmul.mubr.msk.f32.gmra.mrb[2].mxu1 %vm92_vm1, %v79_v15  ;;  %v75_v34 = vld [vmem:[%s3274_s1 + $0x50] sm:$0xff]  ;;  %v76_v36 = vld [vmem:[%s3274_s1 + $0x58] sm:$0xff]  ;;  %v89_v37 = vld [vmem:[%s3274_s1 + $0xc0] sm:$0xff] }
   0xc   :  { %1739 = vmatprep.mubr.msk.f32.mxu0 %vm2252_vm0, %v2253_v4  ;;  %1778 = vmatprep.mubr.msk.f32.mxu1 %vm2252_vm0, %v2253_v4  ;;  %v1004_v38 = vld [vmem:[%s3275_s7] sm:$0xff]  ;;  %v1005_v39 = vld [vmem:[%s3275_s7 + $0x8] sm:$0xff]  ;;  %v1006_v43 = vld [vmem:[%s3275_s7 + $0x10] sm:$0xff] }
   0xd   :  { %2196 = vmatpush3.bf16.msk.msra.mxu0 %vm2195_vm4, %v2194_v17  ;;  %v77_v40 = vld [vmem:[%s3274_s1 + $0x60] sm:$0xff]  ;;  %v2198_v42 = vpack.c.bf16 %v1005_v39, %v1004_v38  ;;  %v1007_v44 = vld [vmem:[%s3275_s7 + $0x18] sm:$0xff]  ;;  %v39_v45 = vld [vmem:[%s3276_s0 + $0x8] sm:$0xff] }
   0xe   :  { %2221 = vmatprep.subr.bf16.mxu0 %v2251_v0  ;;  %v38_v41 = vld [vmem:[%s3276_s0] sm:$0xff]  ;;  %v2201_v47 = vpack.c.bf16 %v1007_v44, %v1006_v43  ;;  %v1009_v49 = vld [vmem:[%s3275_s7 + $0x28] sm:$0xff]  ;;  %v40_v50 = vld [vmem:[%s3276_s0 + $0x10] sm:$0xff] }
   0xf   :  { %1740 = vmatmul.mubr.msk.f32.gmra.mrb[4].mxu0 %vm92_vm1, %v67_v18  ;;  %1779 = vmatmul.mubr.msk.f32.gmra.mrb[4].mxu1 %vm92_vm1, %v80_v19  ;;  %v623_v46 = vld [vmem:[%s3277_s2] sm:$0xff]  ;;  %v624_v51 = vld [vmem:[%s3277_s2 + $0x8] sm:$0xff]  ;;  %v1010_v53 = vld [vmem:[%s3275_s7 + $0x30] sm:$0xff] }
  0x10   :  { %1742 = vmatprep.mubr.msk.f32.mxu0 %vm2252_vm0, %v2253_v4  ;;  %1781 = vmatprep.mubr.msk.f32.mxu1 %vm2252_vm0, %v2253_v4  ;;  %v1008_v48 = vld [vmem:[%s3275_s7 + $0x20] sm:$0xff]  ;;  %v1011_v54 = vld [vmem:[%s3275_s7 + $0x38] sm:$0xff]  ;;  %v625_v56 = vld [vmem:[%s3277_s2 + $0x10] sm:$0xff] }
  0x11   :  { %v2204_v52 = vpack.c.bf16 %v1009_v49, %v1008_v48  ;;  %v41_v55 = vld [vmem:[%s3276_s0 + $0x18] sm:$0xff]  ;;  %v2207_v57 = vpack.c.bf16 %v1011_v54, %v1010_v53  ;;  %v42_v58 = vld [vmem:[%s3276_s0 + $0x20] sm:$0xff]  ;;  %v43_v60 = vld [vmem:[%s3276_s0 + $0x28] sm:$0xff] }
  0x12   :  { %v626_v59 = vld [vmem:[%s3277_s2 + $0x18] sm:$0xff]  ;;  %v627_v61 = vld [vmem:[%s3277_s2 + $0x20] sm:$0xff]  ;;  %v44_v62 = vld [vmem:[%s3276_s0 + $0x30] sm:$0xff] }
  0x13   :  { %1743 = vmatmul.mubr.msk.f32.gmra.mrb[6].mxu0 %vm92_vm1, %v68_v20  ;;  %1782 = vmatmul.mubr.msk.f32.gmra.mrb[6].mxu1 %vm92_vm1, %v81_v21  ;;  %v628_v63 = vld [vmem:[%s3277_s2 + $0x28] sm:$0xff]  ;;  %v45_v1 = vld [vmem:[%s3276_s0 + $0x38] sm:$0xff]  ;;  %v629_v2 = vld [vmem:[%s3277_s2 + $0x30] sm:$0xff] }
  0x14   :  { %1745 = vmatprep.mubr.msk.f32.mxu0 %vm2252_vm0, %v2253_v4  ;;  %1784 = vmatprep.mubr.msk.f32.mxu1 %vm2252_vm0, %v2253_v4  ;;  %v46_v3 = vld [vmem:[%s3276_s0 + $0x40] sm:$0xff]  ;;  %v630_v5 = vld [vmem:[%s3277_s2 + $0x38] sm:$0xff]  ;;  %v47_v6 = vld [vmem:[%s3276_s0 + $0x48] sm:$0xff] }
  0x15   :  { %v631_v7 = vld [vmem:[%s3277_s2 + $0x40] sm:$0xff]  ;;  %v48_v8 = vld [vmem:[%s3276_s0 + $0x50] sm:$0xff]  ;;  %v632_v9 = vld [vmem:[%s3277_s2 + $0x48] sm:$0xff] }
  0x16   :  { %v49_v10 = vld [vmem:[%s3276_s0 + $0x58] sm:$0xff]  ;;  %v633_v11 = vld [vmem:[%s3277_s2 + $0x50] sm:$0xff]  ;;  %v1012_v12 = vld [vmem:[%s3275_s7 + $0x40] sm:$0xff] }
  0x17   :  { %1746 = vmatmul.mubr.msk.f32.gmra.mrb[8].mxu0 %vm92_vm1, %v69_v22  ;;  %1785 = vmatmul.mubr.msk.f32.gmra.mrb[8].mxu1 %vm92_vm1, %v82_v23  ;;  %v1013_v13 = vld [vmem:[%s3275_s7 + $0x48] sm:$0xff]  ;;  %v50_v14 = vld [vmem:[%s3276_s0 + $0x60] sm:$0xff]  ;;  %v634_v15 = vld [vmem:[%s3277_s2 + $0x58] sm:$0xff] }
  0x18   :  { %1748 = vmatprep.mubr.msk.f32.mxu0 %vm2252_vm0, %v2253_v4  ;;  %1787 = vmatprep.mubr.msk.f32.mxu1 %vm2252_vm0, %v2253_v4  ;;  %v2210_v16 = vpack.c.bf16 %v1013_v13, %v1012_v12  ;;  %v51_v17 = vld [vmem:[%s3276_s0 + $0x68] sm:$0xff]  ;;  %v635_v18 = vld [vmem:[%s3277_s2 + $0x60] sm:$0xff]  ;;  %v52_v19 = vld [vmem:[%s3276_s0 + $0x70] sm:$0xff] }
  0x19   :  { %v636_v20 = vld [vmem:[%s3277_s2 + $0x68] sm:$0xff]  ;;  %v1014_v21 = vld [vmem:[%s3275_s7 + $0x50] sm:$0xff]  ;;  %v1015_v22 = vld [vmem:[%s3275_s7 + $0x58] sm:$0xff] }
  0x1a   :  { %v53_v23 = vld [vmem:[%s3276_s0 + $0x78] sm:$0xff]  ;;  %v59_v39 = vld [vmem:[%s3276_s0 + $0xa8] sm:$0xff]  ;;  %v60_v43 = vld [vmem:[%s3276_s0 + $0xb0] sm:$0xff] }
  0x1b   :  { %1749 = vmatmul.mubr.msk.f32.gmra.mrb[10].mxu0 %vm92_vm1, %v70_v24  ;;  %1788 = vmatmul.mubr.msk.f32.gmra.mrb[10].mxu1 %vm92_vm1, %v83_v25  ;;  %v637_v24 = vld [vmem:[%s3277_s2 + $0x70] sm:$0xff]  ;;  %v2213_v25 = vpack.c.bf16 %v1015_v22, %v1014_v21  ;;  %v642_v38 = vld [vmem:[%s3277_s2 + $0x98] sm:$0xff]  ;;  %v644_v44 = vld [vmem:[%s3277_s2 + $0xa8] sm:$0xff] }
  0x1c   :  { %1751 = vmatprep.mubr.msk.f32.mxu0 %vm2252_vm0, %v2253_v4  ;;  %1790 = vmatprep.mubr.msk.f32.mxu1 %vm2252_vm0, %v2253_v4  ;;  %v62_v48 = vld [vmem:[%s3276_s0 + $0xc0] sm:$0xff]  ;;  %v646_v49 = vld [vmem:[%s3277_s2 + $0xb8] sm:$0xff]  ;;  %v1244_v21 = vld [vmem:[%s3278_s9 + $0x10] sm:$0xff] }
  0x1f   :  { %1752 = vmatmul.mubr.msk.f32.gmra.mrb[12].mxu0 %vm92_vm1, %v71_v26  ;;  %1791 = vmatmul.mubr.msk.f32.gmra.mrb[12].mxu1 %vm92_vm1, %v84_v27  ;;  %v54_v26 = vld [vmem:[%s3276_s0 + $0x80] sm:$0xff]  ;;  %v638_v27 = vld [vmem:[%s3277_s2 + $0x78] sm:$0xff] }
  0x20   :  { %1754 = vmatprep.mubr.msk.f32.mxu0 %vm2252_vm0, %v2253_v4  ;;  %1793 = vmatprep.mubr.msk.f32.mxu1 %vm2252_vm0, %v2253_v4 }
  0x23   :  { %1755 = vmatmul.mubr.msk.f32.gmra.mrb[14].mxu0 %vm92_vm1, %v72_v28  ;;  %1794 = vmatmul.mubr.msk.f32.gmra.mrb[14].mxu1 %vm92_vm1, %v85_v29  ;;  %v55_v28 = vld [vmem:[%s3276_s0 + $0x88] sm:$0xff]  ;;  %v639_v29 = vld [vmem:[%s3277_s2 + $0x80] sm:$0xff] }
  0x24   :  { %1757 = vmatprep.mubr.msk.f32.mxu0 %vm2252_vm0, %v2253_v4  ;;  %1796 = vmatprep.mubr.msk.f32.mxu1 %vm2252_vm0, %v2253_v4 }
  0x27   :  { %1758 = vmatmul.mubr.msk.f32.gmra.mrb[16].mxu0 %vm92_vm1, %v73_v30  ;;  %1797 = vmatmul.mubr.msk.f32.gmra.mrb[16].mxu1 %vm92_vm1, %v86_v31  ;;  %v1016_v30 = vld [vmem:[%s3275_s7 + $0x60] sm:$0xff]  ;;  %v1017_v31 = vld [vmem:[%s3275_s7 + $0x68] sm:$0xff] }
  0x28   :  { %1760 = vmatprep.mubr.msk.f32.mxu0 %vm2252_vm0, %v2253_v4  ;;  %1799 = vmatprep.mubr.msk.f32.mxu1 %vm2252_vm0, %v2253_v4 }
  0x2b   :  { %1761 = vmatmul.mubr.msk.f32.gmra.mrb[18].mxu0 %vm92_vm1, %v74_v32  ;;  %1800 = vmatmul.mubr.msk.f32.gmra.mrb[18].mxu1 %vm92_vm1, %v87_v33  ;;  %v56_v32 = vld [vmem:[%s3276_s0 + $0x90] sm:$0xff]  ;;  %v640_v33 = vld [vmem:[%s3277_s2 + $0x88] sm:$0xff] }
  0x2c   :  { %1763 = vmatprep.mubr.msk.f32.mxu0 %vm2252_vm0, %v2253_v4  ;;  %1802 = vmatprep.mubr.msk.f32.mxu1 %vm2252_vm0, %v2253_v4 }
  0x2f   :  { %1764 = vmatmul.mubr.msk.f32.gmra.mrb[20].mxu0 %vm92_vm1, %v75_v34  ;;  %1803 = vmatmul.mubr.msk.f32.gmra.mrb[20].mxu1 %vm92_vm1, %v88_v35  ;;  %v2216_v34 = vpack.c.bf16 %v1017_v31, %v1016_v30  ;;  %v57_v35 = vld [vmem:[%s3276_s0 + $0x98] sm:$0xff]  ;;  %v1247_v30 = vld [vmem:[%s3278_s9 + $0x28] sm:$0xff] }
  0x30   :  { %1766 = vmatprep.mubr.msk.f32.mxu0 %vm2252_vm0, %v2253_v4  ;;  %1805 = vmatprep.mubr.msk.f32.mxu1 %vm2252_vm0, %v2253_v4 }
  0x33   :  { %1767 = vmatmul.mubr.msk.f32.gmra.mrb[22].mxu0 %vm92_vm1, %v76_v36  ;;  %1806 = vmatmul.mubr.msk.f32.gmra.mrb[22].mxu1 %vm92_vm1, %v89_v37  ;;  %v641_v36 = vld [vmem:[%s3277_s2 + $0x90] sm:$0xff]  ;;  %v58_v37 = vld [vmem:[%s3276_s0 + $0xa0] sm:$0xff] }
  0x34   :  { %1769 = vmatprep.mubr.msk.f32.mxu0 %vm2252_vm0, %v2253_v4  ;;  %1812 = vmatprep.mubr.msk.f32.mxu1 %vm2252_vm0, %v2253_v4 }
  0x37   :  { %1770 = vmatmul.mubr.msk.f32.gmra.mrb[24].mxu0 %vm92_vm1, %v77_v40  ;;  %1813 = vmatmul.mubr.msk.f32.vlgmr.msra.gmra.mrb[24].mxu1 %vm92_vm1, %v38_v41  ;;  %v643_v40 = vld [vmem:[%s3277_s2 + $0xa0] sm:$0xff]  ;;  %v1018_v41 = vld [vmem:[%s3275_s7 + $0x70] sm:$0xff] }
  0x38   :  { %1815 = vmatprep.mubr.msk.f32.mxu1 %vm2252_vm0, %v2253_v4  ;;  %1895 = vmatprep.mubr.msk.f32.mxu0 %vm2252_vm0, %v2253_v4 }
  0x39   :  { %2199 = vmatpush3.bf16.msra.mxu1 %v2198_v42  ;;  %v1019_v42 = vld [vmem:[%s3275_s7 + $0x78] sm:$0xff] }
  0x3a   :  { %2200 = vmatprep.subr.bf16.mxu1 %v2251_v0 }
  0x3b   :  { %1816 = vmatmul.mubr.msk.f32.gmra.mrb[26].mxu1 %vm92_vm1, %v39_v45  ;;  %1896 = vmatmul.mubr.msk.f32.vlgmr.msra.gmra.mrb[26].mxu0 %vm652_vm5, %v623_v46  ;;  %v2219_v45 = vpack.c.bf16 %v1019_v42, %v1018_v41  ;;  %v61_v46 = vld [vmem:[%s3276_s0 + $0xb8] sm:$0xff] }
  0x3c   :  { %1818 = vmatprep.mubr.msk.f32.mxu1 %vm2252_vm0, %v2253_v4  ;;  %1898 = vmatprep.mubr.msk.f32.mxu0 %vm2252_vm0, %v2253_v4 }
  0x3d   :  { %2202 = vmatpush3.bf16.msra.mxu1 %v2201_v47  ;;  %v645_v47 = vld [vmem:[%s3277_s2 + $0xb0] sm:$0xff] }
  0x3e   :  { %2203 = vmatprep.subr.bf16.mxu1 %v2251_v0 }
  0x3f   :  { %1819 = vmatmul.mubr.msk.f32.gmra.mrb[28].mxu1 %vm92_vm1, %v40_v50  ;;  %1899 = vmatmul.mubr.msk.f32.gmra.mrb[28].mxu0 %vm652_vm5, %v624_v51  ;;  %v647_v50 = vld [vmem:[%s3277_s2 + $0xc0] sm:$0xff] }
  0x40   :  { %1821 = vmatprep.mubr.msk.f32.mxu1 %vm2252_vm0, %v2253_v4  ;;  %1901 = vmatprep.mubr.msk.f32.mxu0 %vm2252_vm0, %v2253_v4 }
  0x41   :  { %2205 = vmatpush3.bf16.msra.mxu1 %v2204_v52 }
  0x42   :  { %2206 = vmatprep.subr.bf16.mxu1 %v2251_v0 }
  0x43   :  { %1822 = vmatmul.mubr.msk.f32.gmra.mrb[30].mxu1 %vm92_vm1, %v41_v55  ;;  %1902 = vmatmul.mubr.msk.f32.gmra.mrb[30].mxu0 %vm652_vm5, %v625_v56 }
  0x44   :  { %1824 = vmatprep.mubr.msk.f32.mxu1 %vm2252_vm0, %v2253_v4  ;;  %1904 = vmatprep.mubr.msk.f32.mxu0 %vm2252_vm0, %v2253_v4 }
  0x45   :  { %2208 = vmatpush3.bf16.msra.mxu1 %v2207_v57 }
  0x46   :  { %2209 = vmatprep.subr.bf16.mxu1 %v2251_v0 }
  0x47   :  { %1825 = vmatmul.mubr.msk.f32.gmra.mrb[32].mxu1 %vm92_vm1, %v42_v58  ;;  %1905 = vmatmul.mubr.msk.f32.gmra.mrb[32].mxu0 %vm652_vm5, %v626_v59 }
  0x48   :  { %1827 = vmatprep.mubr.msk.f32.mxu1 %vm2252_vm0, %v2253_v4  ;;  %1907 = vmatprep.mubr.msk.f32.mxu0 %vm2252_vm0, %v2253_v4 }
  0x49   :  { %2211 = vmatpush3.bf16.msra.mxu1 %v2210_v16 }
  0x4a   :  { %2212 = vmatprep.subr.bf16.mxu1 %v2251_v0 }
  0x4b   :  { %1828 = vmatmul.mubr.msk.f32.gmra.mrb[34].mxu1 %vm92_vm1, %v43_v60  ;;  %1908 = vmatmul.mubr.msk.f32.gmra.mrb[34].mxu0 %vm652_vm5, %v627_v61 }
  0x4c   :  { %1830 = vmatprep.mubr.msk.f32.mxu1 %vm2252_vm0, %v2253_v4  ;;  %1910 = vmatprep.mubr.msk.f32.mxu0 %vm2252_vm0, %v2253_v4 }
  0x4d   :  { %2214 = vmatpush3.bf16.msra.mxu1 %v2213_v25  ;;  %v1245_v25 = vld [vmem:[%s3278_s9 + $0x18] sm:$0xff] }
  0x4e   :  { %2215 = vmatprep.subr.bf16.mxu1 %v2251_v0 }
  0x4f   :  { %1831 = vmatmul.mubr.msk.f32.gmra.mrb[36].mxu1 %vm92_vm1, %v44_v62  ;;  %1911 = vmatmul.mubr.msk.f32.gmra.mrb[36].mxu0 %vm652_vm5, %v628_v63 }
  0x50   :  { %1833 = vmatprep.mubr.msk.f32.mxu1 %vm2252_vm0, %v2253_v4  ;;  %1913 = vmatprep.mubr.msk.f32.mxu0 %vm2252_vm0, %v2253_v4 }
  0x51   :  { %2217 = vmatpush3.bf16.msra.mxu1 %v2216_v34 }
  0x52   :  { %2218 = vmatprep.subr.bf16.mxu1 %v2251_v0 }
  0x53   :  { %1834 = vmatmul.mubr.msk.f32.gmra.mrb[38].mxu1 %vm92_vm1, %v45_v1  ;;  %1914 = vmatmul.mubr.msk.f32.gmra.mrb[38].mxu0 %vm652_vm5, %v629_v2 }
  0x54   :  { %1836 = vmatprep.mubr.msk.f32.mxu1 %vm2252_vm0, %v2253_v4  ;;  %1916 = vmatprep.mubr.msk.f32.mxu0 %vm2252_vm0, %v2253_v4 }
  0x55   :  { %2220 = vmatpush3.bf16.msra.mxu1 %v2219_v45 }
  0x57   :  { %1837 = vmatmul.mubr.msk.f32.gmra.mrb[40].mxu1 %vm92_vm1, %v46_v3  ;;  %1917 = vmatmul.mubr.msk.f32.gmra.mrb[40].mxu0 %vm652_vm5, %v630_v5 }
  0x58   :  { %1839 = vmatprep.mubr.msk.f32.mxu1 %vm2252_vm0, %v2253_v4  ;;  %1919 = vmatprep.mubr.msk.f32.mxu0 %vm2252_vm0, %v2253_v4 }
  0x5b   :  { %1840 = vmatmul.mubr.msk.f32.gmra.mrb[42].mxu1 %vm92_vm1, %v47_v6  ;;  %1920 = vmatmul.mubr.msk.f32.gmra.mrb[42].mxu0 %vm652_vm5, %v631_v7 }
  0x5c   :  { %1842 = vmatprep.mubr.msk.f32.mxu1 %vm2252_vm0, %v2253_v4  ;;  %1922 = vmatprep.mubr.msk.f32.mxu0 %vm2252_vm0, %v2253_v4 }
  0x5f   :  { %1843 = vmatmul.mubr.msk.f32.gmra.mrb[44].mxu1 %vm92_vm1, %v48_v8  ;;  %1923 = vmatmul.mubr.msk.f32.gmra.mrb[44].mxu0 %vm652_vm5, %v632_v9 }
  0x60   :  { %1845 = vmatprep.mubr.msk.f32.mxu1 %vm2252_vm0, %v2253_v4  ;;  %1925 = vmatprep.mubr.msk.f32.mxu0 %vm2252_vm0, %v2253_v4 }
  0x63   :  { %1846 = vmatmul.mubr.msk.f32.gmra.mrb[46].mxu1 %vm92_vm1, %v49_v10  ;;  %1926 = vmatmul.mubr.msk.f32.gmra.mrb[46].mxu0 %vm652_vm5, %v633_v11 }
  0x64   :  { %1848 = vmatprep.mubr.msk.f32.mxu1 %vm2252_vm0, %v2253_v4  ;;  %1928 = vmatprep.mubr.msk.f32.mxu0 %vm2252_vm0, %v2253_v4 }
  0x67   :  { %1849 = vmatmul.mubr.msk.f32.gmra.mrb[48].mxu1 %vm92_vm1, %v50_v14  ;;  %1929 = vmatmul.mubr.msk.f32.gmra.mrb[48].mxu0 %vm652_vm5, %v634_v15 }
  0x68   :  { %1851 = vmatprep.mubr.msk.f32.mxu1 %vm2252_vm0, %v2253_v4  ;;  %1931 = vmatprep.mubr.msk.f32.mxu0 %vm2252_vm0, %v2253_v4 }
  0x6b   :  { %1852 = vmatmul.mubr.msk.f32.gmra.mrb[50].mxu1 %vm92_vm1, %v51_v17  ;;  %1932 = vmatmul.mubr.msk.f32.gmra.mrb[50].mxu0 %vm652_vm5, %v635_v18 }
  0x6c   :  { %1854 = vmatprep.mubr.msk.f32.mxu1 %vm2252_vm0, %v2253_v4  ;;  %1934 = vmatprep.mubr.msk.f32.mxu0 %vm2252_vm0, %v2253_v4 }
  0x6f   :  { %1855 = vmatmul.mubr.msk.f32.gmra.mrb[52].mxu1 %vm92_vm1, %v52_v19  ;;  %1935 = vmatmul.mubr.msk.f32.gmra.mrb[52].mxu0 %vm652_vm5, %v636_v20  ;;  %v1242_v19 = vld [vmem:[%s3278_s9] sm:$0xff]  ;;  %v1243_v20 = vld [vmem:[%s3278_s9 + $0x8] sm:$0xff] }
  0x70   :  { %1857 = vmatprep.mubr.msk.f32.mxu1 %vm2252_vm0, %v2253_v4  ;;  %1937 = vmatprep.mubr.msk.f32.mxu0 %vm2252_vm0, %v2253_v4 }
  0x73   :  { %1858 = vmatmul.mubr.msk.f32.gmra.mrb[54].mxu1 %vm92_vm1, %v53_v23  ;;  %1938 = vmatmul.mubr.msk.f32.gmra.mrb[54].mxu0 %vm652_vm5, %v637_v24  ;;  %v2222_v24 = vpack.c.bf16 %v1243_v20, %v1242_v19  ;;  %v2956_v19 = vld [vmem:[%s3279_s6] ss:$0 sm:$0xff]  ;;  %v1256_v20 = vld [vmem:[%s3278_s9 + $0x70] sm:$0xff] }
  0x74   :  { %1860 = vmatprep.mubr.msk.f32.mxu1 %vm2252_vm0, %v2253_v4  ;;  %1940 = vmatprep.mubr.msk.f32.mxu0 %vm2252_vm0, %v2253_v4 }
  0x75   :  { %2223 = vmatpush3.bf16.msra.mxu0 %v2222_v24 }
  0x76   :  { %2224 = vmatprep.subr.bf16.mxu0 %v2251_v0 }
  0x77   :  { %1861 = vmatmul.mubr.msk.f32.gmra.mrb[56].mxu1 %vm92_vm1, %v54_v26  ;;  %1941 = vmatmul.mubr.msk.f32.gmra.mrb[56].mxu0 %vm652_vm5, %v638_v27  ;;  %v2225_v26 = vpack.c.bf16 %v1245_v25, %v1244_v21 }
  0x78   :  { %1863 = vmatprep.mubr.msk.f32.mxu1 %vm2252_vm0, %v2253_v4  ;;  %1943 = vmatprep.mubr.msk.f32.mxu0 %vm2252_vm0, %v2253_v4 }
  0x79   :  { %2226 = vmatpush3.bf16.msra.mxu0 %v2225_v26 }
  0x7a   :  { %2227 = vmatprep.subr.bf16.mxu0 %v2251_v0 }
  0x7b   :  { %1864 = vmatmul.mubr.msk.f32.gmra.mrb[58].mxu1 %vm92_vm1, %v55_v28  ;;  %1944 = vmatmul.mubr.msk.f32.gmra.mrb[58].mxu0 %vm652_vm5, %v639_v29  ;;  %v1246_v29 = vld [vmem:[%s3278_s9 + $0x20] sm:$0xff] }
  0x7c   :  { %1866 = vmatprep.mubr.msk.f32.mxu1 %vm2252_vm0, %v2253_v4  ;;  %1946 = vmatprep.mubr.msk.f32.mxu0 %vm2252_vm0, %v2253_v4 }
  0x7f   :  { %1867 = vmatmul.mubr.msk.f32.gmra.mrb[60].mxu1 %vm92_vm1, %v56_v32  ;;  %1947 = vmatmul.mubr.msk.f32.gmra.mrb[60].mxu0 %vm652_vm5, %v640_v33  ;;  %v2228_v33 = vpack.c.bf16 %v1247_v30, %v1246_v29 }
  0x80   :  { %1869 = vmatprep.mubr.msk.f32.mxu1 %vm2252_vm0, %v2253_v4  ;;  %1949 = vmatprep.mubr.msk.f32.mxu0 %vm2252_vm0, %v2253_v4 }
  0x81   :  { %2229 = vmatpush3.bf16.msra.mxu0 %v2228_v33 }
  0x82   :  { %2230 = vmatprep.subr.bf16.mxu0 %v2251_v0 }
  0x83   :  { %1870 = vmatmul.mubr.msk.f32.gmra.mrb[62].mxu1 %vm92_vm1, %v57_v35  ;;  %1950 = vmatmul.mubr.msk.f32.gmra.mrb[62].mxu0 %vm652_vm5, %v641_v36  ;;  %v1248_v36 = vld [vmem:[%s3278_s9 + $0x30] sm:$0xff] }
  0x84   :  { %1872 = vmatprep.mubr.msk.f32.mxu1 %vm2252_vm0, %v2253_v4  ;;  %1952 = vmatprep.mubr.msk.f32.mxu0 %vm2252_vm0, %v2253_v4 }
  0x87   :  { %1873 = vmatmul.mubr.msk.f32.gmra.mrb[64].mxu1 %vm92_vm1, %v58_v37  ;;  %1953 = vmatmul.mubr.msk.f32.gmra.mrb[64].mxu0 %vm652_vm5, %v642_v38  ;;  %v1249_v37 = vld [vmem:[%s3278_s9 + $0x38] sm:$0xff] }
  0x88   :  { %1875 = vmatprep.mubr.msk.f32.mxu1 %vm2252_vm0, %v2253_v4  ;;  %1955 = vmatprep.mubr.msk.f32.mxu0 %vm2252_vm0, %v2253_v4 }
  0x8b   :  { %1876 = vmatmul.mubr.msk.f32.gmra.mrb[66].mxu1 %vm92_vm1, %v59_v39  ;;  %1956 = vmatmul.mubr.msk.f32.gmra.mrb[66].mxu0 %vm652_vm5, %v643_v40  ;;  %v2231_v40 = vpack.c.bf16 %v1249_v37, %v1248_v36 }
  0x8c   :  { %1878 = vmatprep.mubr.msk.f32.mxu1 %vm2252_vm0, %v2253_v4  ;;  %1958 = vmatprep.mubr.msk.f32.mxu0 %vm2252_vm0, %v2253_v4 }
  0x8d   :  { %2232 = vmatpush3.bf16.msra.mxu0 %v2231_v40 }
  0x8e   :  { %2233 = vmatprep.subr.bf16.mxu0 %v2251_v0 }
  0x8f   :  { %1879 = vmatmul.mubr.msk.f32.gmra.mrb[68].mxu1 %vm92_vm1, %v60_v43  ;;  %1959 = vmatmul.mubr.msk.f32.gmra.mrb[68].mxu0 %vm652_vm5, %v644_v44  ;;  %v1250_v43 = vld [vmem:[%s3278_s9 + $0x40] sm:$0xff]  ;;  %v1251_v44 = vld [vmem:[%s3278_s9 + $0x48] sm:$0xff] }
  0x90   :  { %1881 = vmatprep.mubr.msk.f32.mxu1 %vm2252_vm0, %v2253_v4  ;;  %1961 = vmatprep.mubr.msk.f32.mxu0 %vm2252_vm0, %v2253_v4 }
  0x93   :  { %1882 = vmatmul.mubr.msk.f32.gmra.mrb[70].mxu1 %vm92_vm1, %v61_v46  ;;  %1962 = vmatmul.mubr.msk.f32.gmra.mrb[70].mxu0 %vm652_vm5, %v645_v47  ;;  %v2234_v47 = vpack.c.bf16 %v1251_v44, %v1250_v43 }
  0x94   :  { %1884 = vmatprep.mubr.msk.f32.mxu1 %vm2252_vm0, %v2253_v4  ;;  %1964 = vmatprep.mubr.msk.f32.mxu0 %vm2252_vm0, %v2253_v4 }
  0x95   :  { %2235 = vmatpush3.bf16.msra.mxu0 %v2234_v47 }
  0x96   :  { %2236 = vmatprep.subr.bf16.mxu0 %v2251_v0 }
  0x97   :  { %1885 = vmatmul.mubr.msk.f32.gmra.mrb[72].mxu1 %vm92_vm1, %v62_v48  ;;  %1965 = vmatmul.mubr.msk.f32.gmra.mrb[72].mxu0 %vm652_vm5, %v646_v49 }
  0x98   :  { %1967 = vmatprep.mubr.msk.f32.mxu0 %vm2252_vm0, %v2253_v4  ;;  %2002 = vmatprep.mubr.msk.f32.mxu1 %vm2252_vm0, %v2253_v4 }
  0x9b   :  { %1968 = vmatmul.mubr.msk.f32.gmra.mrb[74].mxu0 %vm652_vm5, %v647_v50  ;;  %v1252_v50 = vld [vmem:[%s3278_s9 + $0x50] sm:$0xff] }
  0x9c   :  { %2109 = vmatprep.mubr.msk.f32.mxu0 %vm2252_vm0, %v2253_v4 }
  0xda   :  { %v2855_v51 = vpop.f32.mrb[0].mxu0  ;;  %v2857_v52 = vpop.f32.mrb[0].mxu1 }
  0xdb   :  { %v1735_v53 = vpop.f32.mrb[1].mxu0  ;;  %v1774_v54 = vpop.f32.mrb[1].mxu1 }
  0xdc   :  { %v1253_v53 = vld [vmem:[%s3278_s9 + $0x58] sm:$0xff] }
  0xde   :  { %v2859_v55 = vpop.f32.mrb[2].mxu0  ;;  %v2861_v56 = vpop.f32.mrb[2].mxu1 }
  0xdf   :  { %v1738_v57 = vpop.f32.mrb[3].mxu0  ;;  %v1777_v58 = vpop.f32.mrb[3].mxu1 }
  0xe0   :  { %v2237_v58 = vpack.c.bf16 %v1253_v53, %v1252_v50 }
  0xe2   :  { %v2863_v59 = vpop.f32.mrb[4].mxu0  ;;  %v2865_v60 = vpop.f32.mrb[4].mxu1  ;;  %2238 = vmatpush3.bf16.msra.mxu0 %v2237_v58 }
  0xe3   :  { %v1741_v61 = vpop.f32.mrb[5].mxu0  ;;  %v1780_v62 = vpop.f32.mrb[5].mxu1  ;;  %2239 = vmatprep.subr.bf16.mxu0 %v2251_v0 }
  0xe6   :  { %v2867_v63 = vpop.f32.mrb[6].mxu0  ;;  %v2869_v1 = vpop.f32.mrb[6].mxu1 }
  0xe7   :  { %v1744_v2 = vpop.f32.mrb[7].mxu0  ;;  %v1783_v3 = vpop.f32.mrb[7].mxu1 }
  0xe8   :  { %v1254_v2 = vld [vmem:[%s3278_s9 + $0x60] sm:$0xff]  ;;  %v1255_v3 = vld [vmem:[%s3278_s9 + $0x68] sm:$0xff] }
  0xea   :  { %v2871_v5 = vpop.f32.mrb[8].mxu0  ;;  %v2873_v6 = vpop.f32.mrb[8].mxu1 }
  0xeb   :  { %v1747_v7 = vpop.f32.mrb[9].mxu0  ;;  %v1786_v8 = vpop.f32.mrb[9].mxu1 }
  0xee   :  { %v2875_v9 = vpop.f32.mrb[10].mxu0  ;;  %v2877_v10 = vpop.f32.mrb[10].mxu1 }
  0xef   :  { %v1750_v11 = vpop.f32.mrb[11].mxu0  ;;  %v1789_v12 = vpop.f32.mrb[11].mxu1 }
  0xf0   :  { %v2240_v12 = vpack.c.bf16 %v1255_v3, %v1254_v2 }
  0xf2   :  { %v2879_v13 = vpop.f32.mrb[12].mxu0  ;;  %v2881_v14 = vpop.f32.mrb[12].mxu1  ;;  %2241 = vmatpush3.bf16.msra.mxu0 %v2240_v12 }
  0xf3   :  { %v1753_v15 = vpop.f32.mrb[13].mxu0  ;;  %v1792_v16 = vpop.f32.mrb[13].mxu1  ;;  %2242 = vmatprep.subr.bf16.mxu0 %v2251_v0 }
  0xf6   :  { %v2883_v17 = vpop.f32.mrb[14].mxu0  ;;  %v2885_v18 = vpop.f32.mrb[14].mxu1 }
  0xf7   :  { %v1756_v22 = vpop.f32.mrb[15].mxu0  ;;  %v1795_v23 = vpop.f32.mrb[15].mxu1 }
  0xfa   :  { %v2899_v27 = vpop.f32.mrb[16].mxu0  ;;  %v2901_v28 = vpop.f32.mrb[16].mxu1 }
  0xfb   :  { %v1759_v31 = vpop.f32.mrb[17].mxu0  ;;  %v1798_v32 = vpop.f32.mrb[17].mxu1 }
  0xfe   :  { %v2910_v34 = vpop.f32.mrb[18].mxu0  ;;  %v2912_v35 = vpop.f32.mrb[18].mxu1 }
  0xff   :  { %v1762_v38 = vpop.f32.mrb[19].mxu0  ;;  %v1801_v39 = vpop.f32.mrb[19].mxu1 }
 0x102   :  { %v2921_v41 = vpop.f32.mrb[20].mxu0  ;;  %v2923_v42 = vpop.f32.mrb[20].mxu1 }
 0x103   :  { %v1765_v45 = vpop.f32.mrb[21].mxu0  ;;  %v1804_v46 = vpop.f32.mrb[21].mxu1 }
 0x106   :  { %v2932_v48 = vpop.f32.mrb[22].mxu0  ;;  %v2934_v49 = vpop.f32.mrb[22].mxu1 }
 0x107   :  { %v1768_v54 = vpop.f32.mrb[23].mxu0  ;;  %v1807_v57 = vpop.f32.mrb[23].mxu1 }
 0x10a   :  { %v2943_v61 = vpop.f32.mrb[24].mxu0  ;;  %v499_v62 = vpop.f32.mrb[24].mxu1 }
 0x10b   :  { %v500_v7 = vadd.f32 %v499_v62, %v2855_v51  ;;  %v1771_v8 = vpop.f32.mrb[25].mxu0  ;;  %v1814_v11 = vpop.f32.mrb[25].mxu1  ;;  %v1257_v51 = vld [vmem:[%s3278_s9 + $0x78] sm:$0xff] }
 0x10c   :  { %v2243_v26 = vpack.c.bf16 %v1257_v51, %v1256_v20 }
 0x10e   :  { %v504_v15 = vpop.f32.mrb[26].mxu1  ;;  %v798_v16 = vpop.f32.mrb[26].mxu0  ;;  %2244 = vmatpush3.bf16.msra.mxu0 %v2243_v26 }
 0x10f   :  { %v505_v21 = vadd.f32 %v504_v15, %v2859_v55  ;;  %v922_v22 = vadd.f32 %v798_v16, %v500_v7  ;;  %v1897_v23 = vpop.f32.mrb[27].mxu0  ;;  %v1817_v24 = vpop.f32.mrb[27].mxu1 }
 0x111   :  { %v954_v25 = vadd.f32 %v2956_v19, %v922_v22 }
 0x112   :  { %v509_v29 = vpop.f32.mrb[28].mxu1  ;;  %v803_v30 = vpop.f32.mrb[28].mxu0 }
 0x113   :  { %v979_v31 = vmax.f32 %v954_v25, 0.0  ;;  %v510_v32 = vadd.f32 %v509_v29, %v2863_v59  ;;  %v923_v33 = vadd.f32 %v803_v30, %v505_v21  ;;  %v1900_v36 = vpop.f32.mrb[29].mxu0  ;;  %v1820_v37 = vpop.f32.mrb[29].mxu1 }
 0x115   :  { %v955_v38 = vadd.f32 %v2956_v19, %v923_v33  ;;  %2003 = vmatmul.mubr.f32.vlgmr.msra.gmra.mrb[74].mxu1 %v979_v31 }
 0x116   :  { %v514_v55 = vpop.f32.mrb[30].mxu1  ;;  %v808_v39 = vpop.f32.mrb[30].mxu0  ;;  %2005 = vmatprep.mubr.msk.f32.mxu1 %vm2252_vm0, %v2253_v4 }
 0x117   :  { %v980_v40 = vmax.f32 %v955_v38, 0.0  ;;  %v515_v43 = vadd.f32 %v514_v55, %v2867_v63  ;;  %v924_v44 = vadd.f32 %v808_v39, %v510_v32  ;;  %v1903_v0 = vpop.f32.mrb[31].mxu0  ;;  %v1823_v45 = vpop.f32.mrb[31].mxu1 }
 0x119   :  { %v956_v59 = vadd.f32 %v2956_v19, %v924_v44  ;;  %2006 = vmatmul.mubr.f32.gmra.mrb[76].mxu1 %v980_v40 }
 0x11a   :  { %v519_v46 = vpop.f32.mrb[32].mxu1  ;;  %v813_v47 = vpop.f32.mrb[32].mxu0  ;;  %2008 = vmatprep.mubr.msk.f32.mxu1 %vm2252_vm0, %v2253_v4 }
 0x11b   :  { %v981_v50 = vmax.f32 %v956_v59, 0.0  ;;  %v520_v53 = vadd.f32 %v519_v46, %v2871_v5  ;;  %v925_v54 = vadd.f32 %v813_v47, %v515_v43  ;;  %v1906_v57 = vpop.f32.mrb[33].mxu0  ;;  %v1826_v58 = vpop.f32.mrb[33].mxu1 }
 0x11d   :  { %v957_v62 = vadd.f32 %v2956_v19, %v925_v54  ;;  %2009 = vmatmul.mubr.f32.gmra.mrb[78].mxu1 %v981_v50 }
 0x11e   :  { %v524_v63 = vpop.f32.mrb[34].mxu1  ;;  %v818_v2 = vpop.f32.mrb[34].mxu0  ;;  %2011 = vmatprep.mubr.msk.f32.mxu1 %vm2252_vm0, %v2253_v4 }
 0x11f   :  { %v982_v3 = vmax.f32 %v957_v62, 0.0  ;;  %v525_v7 = vadd.f32 %v524_v63, %v2875_v9  ;;  %v926_v8 = vadd.f32 %v818_v2, %v520_v53  ;;  %v1909_v11 = vpop.f32.mrb[35].mxu0  ;;  %v1829_v12 = vpop.f32.mrb[35].mxu1 }
 0x121   :  { %v958_v15 = vadd.f32 %v2956_v19, %v926_v8  ;;  %2012 = vmatmul.mubr.f32.gmra.mrb[80].mxu1 %v982_v3 }
 0x122   :  { %v529_v5 = vpop.f32.mrb[36].mxu1  ;;  %v823_v16 = vpop.f32.mrb[36].mxu0  ;;  %2014 = vmatprep.mubr.msk.f32.mxu1 %vm2252_vm0, %v2253_v4 }
 0x123   :  { %v983_v20 = vmax.f32 %v958_v15, 0.0  ;;  %v530_v51 = vadd.f32 %v529_v5, %v2879_v13  ;;  %v927_v21 = vadd.f32 %v823_v16, %v525_v7  ;;  %v1912_v22 = vpop.f32.mrb[37].mxu0  ;;  %v1832_v23 = vpop.f32.mrb[37].mxu1 }
 0x125   :  { %v959_v24 = vadd.f32 %v2956_v19, %v927_v21  ;;  %2015 = vmatmul.mubr.f32.gmra.mrb[82].mxu1 %v983_v20 }
 0x126   :  { %v534_v9 = vpop.f32.mrb[38].mxu1  ;;  %v828_v25 = vpop.f32.mrb[38].mxu0  ;;  %2017 = vmatprep.mubr.msk.f32.mxu1 %vm2252_vm0, %v2253_v4 }
 0x127   :  { %v984_v26 = vmax.f32 %v959_v24, 0.0  ;;  %v535_v29 = vadd.f32 %v534_v9, %v2883_v17  ;;  %v928_v30 = vadd.f32 %v828_v25, %v530_v51  ;;  %v1915_v31 = vpop.f32.mrb[39].mxu0  ;;  %v1835_v32 = vpop.f32.mrb[39].mxu1 }
 0x129   :  { %v960_v33 = vadd.f32 %v2956_v19, %v928_v30  ;;  %2018 = vmatmul.mubr.f32.gmra.mrb[84].mxu1 %v984_v26 }
 0x12a   :  { %v539_v13 = vpop.f32.mrb[40].mxu1  ;;  %v833_v36 = vpop.f32.mrb[40].mxu0  ;;  %2020 = vmatprep.mubr.msk.f32.mxu1 %vm2252_vm0, %v2253_v4 }
 0x12b   :  { %v985_v37 = vmax.f32 %v960_v33, 0.0  ;;  %v540_v38 = vadd.f32 %v539_v13, %v2899_v27  ;;  %v929_v55 = vadd.f32 %v833_v36, %v535_v29  ;;  %v1918_v39 = vpop.f32.mrb[41].mxu0  ;;  %v1838_v40 = vpop.f32.mrb[41].mxu1 }
 0x12d   :  { %v961_v43 = vadd.f32 %v2956_v19, %v929_v55  ;;  %2021 = vmatmul.mubr.f32.gmra.mrb[86].mxu1 %v985_v37 }
 0x12e   :  { %v544_v17 = vpop.f32.mrb[42].mxu1  ;;  %v838_v44 = vpop.f32.mrb[42].mxu0  ;;  %2023 = vmatprep.mubr.msk.f32.mxu1 %vm2252_vm0, %v2253_v4 }
 0x12f   :  { %v986_v0 = vmax.f32 %v961_v43, 0.0  ;;  %v545_v45 = vadd.f32 %v544_v17, %v2910_v34  ;;  %v930_v59 = vadd.f32 %v838_v44, %v540_v38  ;;  %v1921_v46 = vpop.f32.mrb[43].mxu0  ;;  %v1841_v47 = vpop.f32.mrb[43].mxu1 }
 0x131   :  { %v962_v50 = vadd.f32 %v2956_v19, %v930_v59  ;;  %2024 = vmatmul.mubr.f32.gmra.mrb[88].mxu1 %v986_v0 }
 0x132   :  { %v549_v27 = vpop.f32.mrb[44].mxu1  ;;  %v843_v53 = vpop.f32.mrb[44].mxu0  ;;  %2026 = vmatprep.mubr.msk.f32.mxu1 %vm2252_vm0, %v2253_v4 }
 0x133   :  { %v987_v54 = vmax.f32 %v962_v50, 0.0  ;;  %v550_v57 = vadd.f32 %v549_v27, %v2921_v41  ;;  %v931_v58 = vadd.f32 %v843_v53, %v545_v45  ;;  %v1924_v62 = vpop.f32.mrb[45].mxu0  ;;  %v1844_v63 = vpop.f32.mrb[45].mxu1 }
 0x135   :  { %v963_v2 = vadd.f32 %v2956_v19, %v931_v58  ;;  %2027 = vmatmul.mubr.f32.gmra.mrb[90].mxu1 %v987_v54 }
 0x136   :  { %v554_v34 = vpop.f32.mrb[46].mxu1  ;;  %v848_v3 = vpop.f32.mrb[46].mxu0  ;;  %2029 = vmatprep.mubr.msk.f32.mxu1 %vm2252_vm0, %v2253_v4 }
 0x137   :  { %v988_v7 = vmax.f32 %v963_v2, 0.0  ;;  %v555_v8 = vadd.f32 %v554_v34, %v2932_v48  ;;  %v932_v11 = vadd.f32 %v848_v3, %v550_v57  ;;  %v1927_v12 = vpop.f32.mrb[47].mxu0  ;;  %v1847_v15 = vpop.f32.mrb[47].mxu1 }
 0x139   :  { %v964_v5 = vadd.f32 %v2956_v19, %v932_v11  ;;  %2030 = vmatmul.mubr.f32.gmra.mrb[92].mxu1 %v988_v7 }
 0x13a   :  { %v559_v41 = vpop.f32.mrb[48].mxu1  ;;  %v853_v16 = vpop.f32.mrb[48].mxu0  ;;  %2032 = vmatprep.mubr.msk.f32.mxu1 %vm2252_vm0, %v2253_v4 }
 0x13b   :  { %v989_v20 = vmax.f32 %v964_v5, 0.0  ;;  %v560_v51 = vadd.f32 %v559_v41, %v2943_v61  ;;  %v933_v21 = vadd.f32 %v853_v16, %v555_v8  ;;  %v1930_v22 = vpop.f32.mrb[49].mxu0  ;;  %v1850_v23 = vpop.f32.mrb[49].mxu1 }
 0x13d   :  { %v965_v24 = vadd.f32 %v2956_v19, %v933_v21  ;;  %2033 = vmatmul.mubr.f32.gmra.mrb[94].mxu1 %v989_v20 }
 0x13e   :  { %v564_v48 = vpop.f32.mrb[50].mxu1  ;;  %v858_v9 = vpop.f32.mrb[50].mxu0  ;;  %2035 = vmatprep.mubr.msk.f32.mxu1 %vm2252_vm0, %v2253_v4 }
 0x13f   :  { %v990_v25 = vmax.f32 %v965_v24, 0.0  ;;  %v565_v26 = vadd.f32 %v564_v48, %v2857_v52  ;;  %v934_v29 = vadd.f32 %v858_v9, %v560_v51  ;;  %v1933_v30 = vpop.f32.mrb[51].mxu0  ;;  %v1853_v31 = vpop.f32.mrb[51].mxu1 }
 0x141   :  { %v966_v32 = vadd.f32 %v2956_v19, %v934_v29  ;;  %2036 = vmatmul.mubr.f32.gmra.mrb[96].mxu1 %v990_v25 }
 0x142   :  { %v569_v61 = vpop.f32.mrb[52].mxu1  ;;  %v863_v33 = vpop.f32.mrb[52].mxu0  ;;  %2038 = vmatprep.mubr.msk.f32.mxu1 %vm2252_vm0, %v2253_v4 }
 0x143   :  { %v991_v13 = vmax.f32 %v966_v32, 0.0  ;;  %v570_v36 = vadd.f32 %v569_v61, %v2861_v56  ;;  %v935_v37 = vadd.f32 %v863_v33, %v565_v26  ;;  %v1936_v38 = vpop.f32.mrb[53].mxu0  ;;  %v1856_v55 = vpop.f32.mrb[53].mxu1 }
 0x145   :  { %v967_v39 = vadd.f32 %v2956_v19, %v935_v37  ;;  %2039 = vmatmul.mubr.f32.gmra.mrb[98].mxu1 %v991_v13 }
 0x146   :  { %v574_v52 = vpop.f32.mrb[54].mxu1  ;;  %v868_v40 = vpop.f32.mrb[54].mxu0  ;;  %2041 = vmatprep.mubr.msk.f32.mxu1 %vm2252_vm0, %v2253_v4 }
 0x147   :  { %v992_v43 = vmax.f32 %v967_v39, 0.0  ;;  %v575_v17 = vadd.f32 %v574_v52, %v2865_v60  ;;  %v936_v44 = vadd.f32 %v868_v40, %v570_v36  ;;  %v1939_v0 = vpop.f32.mrb[55].mxu0  ;;  %v1859_v45 = vpop.f32.mrb[55].mxu1 }
 0x149   :  { %v968_v59 = vadd.f32 %v2956_v19, %v936_v44  ;;  %2042 = vmatmul.mubr.f32.gmra.mrb[100].mxu1 %v992_v43 }
 0x14a   :  { %v579_v56 = vpop.f32.mrb[56].mxu1  ;;  %v873_v46 = vpop.f32.mrb[56].mxu0  ;;  %2044 = vmatprep.mubr.msk.f32.mxu1 %vm2252_vm0, %v2253_v4 }
 0x14b   :  { %v993_v47 = vmax.f32 %v968_v59, 0.0  ;;  %v580_v50 = vadd.f32 %v579_v56, %v2869_v1  ;;  %v937_v27 = vadd.f32 %v873_v46, %v575_v17  ;;  %v1942_v53 = vpop.f32.mrb[57].mxu0  ;;  %v1862_v54 = vpop.f32.mrb[57].mxu1 }
 0x14d   :  { %v969_v57 = vadd.f32 %v2956_v19, %v937_v27  ;;  %2045 = vmatmul.mubr.f32.gmra.mrb[102].mxu1 %v993_v47 }
 0x14e   :  { %v584_v60 = vpop.f32.mrb[58].mxu1  ;;  %v878_v58 = vpop.f32.mrb[58].mxu0  ;;  %2047 = vmatprep.mubr.msk.f32.mxu1 %vm2252_vm0, %v2253_v4 }
 0x14f   :  { %v994_v62 = vmax.f32 %v969_v57, 0.0  ;;  %v585_v63 = vadd.f32 %v584_v60, %v2873_v6  ;;  %v938_v2 = vadd.f32 %v878_v58, %v580_v50  ;;  %v1945_v34 = vpop.f32.mrb[59].mxu0  ;;  %v1865_v3 = vpop.f32.mrb[59].mxu1 }
 0x151   :  { %v970_v7 = vadd.f32 %v2956_v19, %v938_v2  ;;  %2048 = vmatmul.mubr.f32.gmra.mrb[104].mxu1 %v994_v62 }
 0x152   :  { %v589_v1 = vpop.f32.mrb[60].mxu1  ;;  %v883_v8 = vpop.f32.mrb[60].mxu0  ;;  %2050 = vmatprep.mubr.msk.f32.mxu1 %vm2252_vm0, %v2253_v4 }
 0x153   :  { %v995_v11 = vmax.f32 %v970_v7, 0.0  ;;  %v590_v12 = vadd.f32 %v589_v1, %v2877_v10  ;;  %v939_v15 = vadd.f32 %v883_v8, %v585_v63  ;;  %v1948_v5 = vpop.f32.mrb[61].mxu0  ;;  %v1868_v41 = vpop.f32.mrb[61].mxu1  ;;  %v3066_v1 = vld [vmem:[%s3280_s8] ss:$0 sm:$0xff] }
 0x155   :  { %v971_v16 = vadd.f32 %v2956_v19, %v939_v15  ;;  %2051 = vmatmul.mubr.f32.gmra.mrb[106].mxu1 %v995_v11 }
 0x156   :  { %v594_v6 = vpop.f32.mrb[62].mxu1  ;;  %v888_v20 = vpop.f32.mrb[62].mxu0  ;;  %2053 = vmatprep.mubr.msk.f32.mxu1 %vm2252_vm0, %v2253_v4 }
 0x157   :  { %v996_v51 = vmax.f32 %v971_v16, 0.0  ;;  %v595_v21 = vadd.f32 %v594_v6, %v2881_v14  ;;  %v940_v22 = vadd.f32 %v888_v20, %v590_v12  ;;  %v1951_v23 = vpop.f32.mrb[63].mxu0  ;;  %v1871_v24 = vpop.f32.mrb[63].mxu1 }
 0x159   :  { %v972_v48 = vadd.f32 %v2956_v19, %v940_v22  ;;  %2054 = vmatmul.mubr.f32.gmra.mrb[108].mxu1 %v996_v51 }
 0x15a   :  { %v599_v10 = vpop.f32.mrb[64].mxu1  ;;  %v893_v9 = vpop.f32.mrb[64].mxu0  ;;  %2056 = vmatprep.mubr.msk.f32.mxu1 %vm2252_vm0, %v2253_v4 }
 0x15b   :  { %v997_v25 = vmax.f32 %v972_v48, 0.0  ;;  %v600_v26 = vadd.f32 %v599_v10, %v2885_v18  ;;  %v941_v29 = vadd.f32 %v893_v9, %v595_v21  ;;  %v1954_v30 = vpop.f32.mrb[65].mxu0  ;;  %v1874_v31 = vpop.f32.mrb[65].mxu1 }
 0x15d   :  { %v973_v32 = vadd.f32 %v2956_v19, %v941_v29  ;;  %2057 = vmatmul.mubr.f32.gmra.mrb[110].mxu1 %v997_v25 }
 0x15e   :  { %v604_v14 = vpop.f32.mrb[66].mxu1  ;;  %v898_v61 = vpop.f32.mrb[66].mxu0  ;;  %2059 = vmatprep.mubr.msk.f32.mxu1 %vm2252_vm0, %v2253_v4 }
 0x15f   :  { %v998_v33 = vmax.f32 %v973_v32, 0.0  ;;  %v605_v13 = vadd.f32 %v604_v14, %v2901_v28  ;;  %v942_v36 = vadd.f32 %v898_v61, %v600_v26  ;;  %v1957_v37 = vpop.f32.mrb[67].mxu0  ;;  %v1877_v38 = vpop.f32.mrb[67].mxu1 }
 0x161   :  { %v974_v55 = vadd.f32 %v2956_v19, %v942_v36  ;;  %2060 = vmatmul.mubr.f32.gmra.mrb[112].mxu1 %v998_v33 }
 0x162   :  { %v609_v18 = vpop.f32.mrb[68].mxu1  ;;  %v903_v39 = vpop.f32.mrb[68].mxu0  ;;  %2062 = vmatprep.mubr.msk.f32.mxu1 %vm2252_vm0, %v2253_v4 }
 0x163   :  { %v999_v52 = vmax.f32 %v974_v55, 0.0  ;;  %v610_v40 = vadd.f32 %v609_v18, %v2912_v35  ;;  %v943_v43 = vadd.f32 %v903_v39, %v605_v13  ;;  %v1960_v17 = vpop.f32.mrb[69].mxu0  ;;  %v1880_v44 = vpop.f32.mrb[69].mxu1 }
 0x165   :  { %v975_v0 = vadd.f32 %v2956_v19, %v943_v43  ;;  %2063 = vmatmul.mubr.f32.gmra.mrb[114].mxu1 %v999_v52 }
 0x166   :  { %v614_v28 = vpop.f32.mrb[70].mxu1  ;;  %v908_v45 = vpop.f32.mrb[70].mxu0  ;;  %2065 = vmatprep.mubr.msk.f32.mxu1 %vm2252_vm0, %v2253_v4 }
 0x167   :  { %v1000_v59 = vmax.f32 %v975_v0, 0.0  ;;  %v615_v56 = vadd.f32 %v614_v28, %v2923_v42  ;;  %v944_v46 = vadd.f32 %v908_v45, %v610_v40  ;;  %v1963_v47 = vpop.f32.mrb[71].mxu0  ;;  %v1883_v50 = vpop.f32.mrb[71].mxu1 }
 0x169   :  { %v976_v27 = vadd.f32 %v2956_v19, %v944_v46  ;;  %2066 = vmatmul.mubr.f32.gmra.mrb[116].mxu1 %v1000_v59 }
 0x16a   :  { %v619_v35 = vpop.f32.mrb[72].mxu1  ;;  %v913_v53 = vpop.f32.mrb[72].mxu0  ;;  %2068 = vmatprep.mubr.msk.f32.mxu1 %vm2252_vm0, %v2253_v4 }
 0x16b   :  { %v1001_v54 = vmax.f32 %v976_v27, 0.0  ;;  %v620_v57 = vadd.f32 %v619_v35, %v2934_v49  ;;  %v945_v60 = vadd.f32 %v913_v53, %v615_v56  ;;  %v1966_v58 = vpop.f32.mrb[73].mxu0  ;;  %v1886_v62 = vpop.f32.mrb[73].mxu1 }
 0x16d   :  { %v977_v63 = vadd.f32 %v2956_v19, %v945_v60  ;;  %2069 = vmatmul.mubr.f32.gmra.mrb[118].mxu1 %v1001_v54 }
 0x16e   :  { %v918_v42 = vpop.f32.mrb[74].mxu0  ;;  %2071 = vmatprep.mubr.msk.f32.mxu1 %vm2252_vm0, %v2253_v4 }
 0x16f   :  { %v1002_v2 = vmax.f32 %v977_v63, 0.0  ;;  %v946_v34 = vadd.f32 %v918_v42, %v620_v57  ;;  %v1969_v3 = vpop.f32.mrb[75].mxu0 }
 0x171   :  { %v978_v7 = vadd.f32 %v2956_v19, %v946_v34  ;;  %2072 = vmatmul.mubr.f32.gmra.mrb[120].mxu1 %v1002_v2 }
 0x172   :  { %2074 = vmatprep.mubr.msk.f32.mxu1 %vm2252_vm0, %v2253_v4 }
 0x173   :  { %v1003_v49 = vmax.f32 %v978_v7, 0.0 }
 0x175   :  { %2075 = vmatmul.mubr.f32.gmra.mrb[122].mxu1 %v1003_v49 }
 0x1e8   :  { %v1093_v8 = vpop.f32.mrb[74].mxu1 }
 0x1e9   :  { %v1094_v11 = vadd.f32 %v3066_v1, %v1093_v8  ;;  %v2004_v12 = vpop.f32.mrb[75].mxu1 }
 0x1eb   :  { %v1217_v15 = vmax.f32 %v1094_v11, 0.0 }
 0x1ec   :  { %v1098_v5 = vpop.f32.mrb[76].mxu1 }
 0x1ed   :  { %v1099_v41 = vadd.f32 %v3066_v1, %v1098_v5  ;;  %v2007_v19 = vpop.f32.mrb[77].mxu1  ;;  %2110 = vmatmul.mubr.f32.vlgmr.msra.gmra.mrb[76].mxu0 %v1217_v15 }
 0x1ee   :  { %2112 = vmatprep.mubr.msk.f32.mxu0 %vm2252_vm0, %v2253_v4 }
 0x1ef   :  { %v1218_v16 = vmax.f32 %v1099_v41, 0.0 }
 0x1f0   :  { %v1103_v6 = vpop.f32.mrb[78].mxu1 }
 0x1f1   :  { %v1104_v20 = vadd.f32 %v3066_v1, %v1103_v6  ;;  %v2010_v51 = vpop.f32.mrb[79].mxu1  ;;  %2113 = vmatmul.mubr.f32.gmra.mrb[78].mxu0 %v1218_v16 }
 0x1f2   :  { %2115 = vmatprep.mubr.msk.f32.mxu0 %vm2252_vm0, %v2253_v4 }
 0x1f3   :  { %v1219_v21 = vmax.f32 %v1104_v20, 0.0 }
 0x1f4   :  { %v1108_v22 = vpop.f32.mrb[80].mxu1 }
 0x1f5   :  { %v1109_v23 = vadd.f32 %v3066_v1, %v1108_v22  ;;  %v2013_v24 = vpop.f32.mrb[81].mxu1  ;;  %2116 = vmatmul.mubr.f32.gmra.mrb[80].mxu0 %v1219_v21 }
 0x1f6   :  { %2118 = vmatprep.mubr.msk.f32.mxu0 %vm2252_vm0, %v2253_v4 }
 0x1f7   :  { %v1220_v48 = vmax.f32 %v1109_v23, 0.0 }
 0x1f8   :  { %v1113_v10 = vpop.f32.mrb[82].mxu1 }
 0x1f9   :  { %v1114_v9 = vadd.f32 %v3066_v1, %v1113_v10  ;;  %v2016_v25 = vpop.f32.mrb[83].mxu1  ;;  %2119 = vmatmul.mubr.f32.gmra.mrb[82].mxu0 %v1220_v48 }
 0x1fa   :  { %2121 = vmatprep.mubr.msk.f32.mxu0 %vm2252_vm0, %v2253_v4 }
 0x1fb   :  { %v1221_v26 = vmax.f32 %v1114_v9, 0.0 }
 0x1fc   :  { %v1118_v29 = vpop.f32.mrb[84].mxu1 }
 0x1fd   :  { %v1119_v30 = vadd.f32 %v3066_v1, %v1118_v29  ;;  %v2019_v31 = vpop.f32.mrb[85].mxu1  ;;  %2122 = vmatmul.mubr.f32.gmra.mrb[84].mxu0 %v1221_v26 }
 0x1fe   :  { %2124 = vmatprep.mubr.msk.f32.mxu0 %vm2252_vm0, %v2253_v4 }
 0x1ff   :  { %v1222_v32 = vmax.f32 %v1119_v30, 0.0 }
 0x200   :  { %v1123_v14 = vpop.f32.mrb[86].mxu1 }
 0x201   :  { %v1124_v61 = vadd.f32 %v3066_v1, %v1123_v14  ;;  %v2022_v33 = vpop.f32.mrb[87].mxu1  ;;  %2125 = vmatmul.mubr.f32.gmra.mrb[86].mxu0 %v1222_v32 }
 0x202   :  { %2127 = vmatprep.mubr.msk.f32.mxu0 %vm2252_vm0, %v2253_v4 }
 0x203   :  { %v1223_v13 = vmax.f32 %v1124_v61, 0.0 }
 0x204   :  { %v1128_v36 = vpop.f32.mrb[88].mxu1 }
 0x205   :  { %v1129_v37 = vadd.f32 %v3066_v1, %v1128_v36  ;;  %v2025_v38 = vpop.f32.mrb[89].mxu1  ;;  %2128 = vmatmul.mubr.f32.gmra.mrb[88].mxu0 %v1223_v13 }
 0x206   :  { %2130 = vmatprep.mubr.msk.f32.mxu0 %vm2252_vm0, %v2253_v4 }
 0x207   :  { %v1224_v55 = vmax.f32 %v1129_v37, 0.0 }
 0x208   :  { %v1133_v18 = vpop.f32.mrb[90].mxu1 }
 0x209   :  { %v1134_v39 = vadd.f32 %v3066_v1, %v1133_v18  ;;  %v2028_v52 = vpop.f32.mrb[91].mxu1  ;;  %2131 = vmatmul.mubr.f32.gmra.mrb[90].mxu0 %v1224_v55 }
 0x20a   :  { %2133 = vmatprep.mubr.msk.f32.mxu0 %vm2252_vm0, %v2253_v4 }
 0x20b   :  { %v1225_v40 = vmax.f32 %v1134_v39, 0.0 }
 0x20c   :  { %v1138_v43 = vpop.f32.mrb[92].mxu1 }
 0x20d   :  { %v1139_v17 = vadd.f32 %v3066_v1, %v1138_v43  ;;  %v2031_v44 = vpop.f32.mrb[93].mxu1  ;;  %2134 = vmatmul.mubr.f32.gmra.mrb[92].mxu0 %v1225_v40 }
 0x20e   :  { %2136 = vmatprep.mubr.msk.f32.mxu0 %vm2252_vm0, %v2253_v4  ;;  %v3144_v44 = vld [vmem:[%s3281_s10] ss:$0 sm:$0xff] }
 0x20f   :  { %v1226_v0 = vmax.f32 %v1139_v17, 0.0 }
 0x210   :  { %v1143_v28 = vpop.f32.mrb[94].mxu1 }
 0x211   :  { %v1144_v45 = vadd.f32 %v3066_v1, %v1143_v28  ;;  %v2034_v59 = vpop.f32.mrb[95].mxu1  ;;  %2137 = vmatmul.mubr.f32.gmra.mrb[94].mxu0 %v1226_v0 }
 0x212   :  { %2139 = vmatprep.mubr.msk.f32.mxu0 %vm2252_vm0, %v2253_v4 }
 0x213   :  { %v1227_v56 = vmax.f32 %v1144_v45, 0.0 }
 0x214   :  { %v1148_v46 = vpop.f32.mrb[96].mxu1 }
 0x215   :  { %v1149_v47 = vadd.f32 %v3066_v1, %v1148_v46  ;;  %v2037_v50 = vpop.f32.mrb[97].mxu1  ;;  %2140 = vmatmul.mubr.f32.gmra.mrb[96].mxu0 %v1227_v56 }
 0x216   :  { %2142 = vmatprep.mubr.msk.f32.mxu0 %vm2252_vm0, %v2253_v4 }
 0x217   :  { %v1228_v27 = vmax.f32 %v1149_v47, 0.0 }
 0x218   :  { %v1153_v35 = vpop.f32.mrb[98].mxu1 }
 0x219   :  { %v1154_v53 = vadd.f32 %v3066_v1, %v1153_v35  ;;  %v2040_v54 = vpop.f32.mrb[99].mxu1  ;;  %2143 = vmatmul.mubr.f32.gmra.mrb[98].mxu0 %v1228_v27 }
 0x21a   :  { %2145 = vmatprep.mubr.msk.f32.mxu0 %vm2252_vm0, %v2253_v4 }
 0x21b   :  { %v1229_v57 = vmax.f32 %v1154_v53, 0.0 }
 0x21c   :  { %v1158_v60 = vpop.f32.mrb[100].mxu1 }
 0x21d   :  { %v1159_v58 = vadd.f32 %v3066_v1, %v1158_v60  ;;  %v2043_v62 = vpop.f32.mrb[101].mxu1  ;;  %2146 = vmatmul.mubr.f32.gmra.mrb[100].mxu0 %v1229_v57 }
 0x21e   :  { %2148 = vmatprep.mubr.msk.f32.mxu0 %vm2252_vm0, %v2253_v4 }
 0x21f   :  { %v1230_v63 = vmax.f32 %v1159_v58, 0.0 }
 0x220   :  { %v1163_v42 = vpop.f32.mrb[102].mxu1 }
 0x221   :  { %v1164_v2 = vadd.f32 %v3066_v1, %v1163_v42  ;;  %v2046_v34 = vpop.f32.mrb[103].mxu1  ;;  %2149 = vmatmul.mubr.f32.gmra.mrb[102].mxu0 %v1230_v63 }
 0x222   :  { %2151 = vmatprep.mubr.msk.f32.mxu0 %vm2252_vm0, %v2253_v4 }
 0x223   :  { %v1231_v3 = vmax.f32 %v1164_v2, 0.0 }
 0x224   :  { %v1168_v7 = vpop.f32.mrb[104].mxu1 }
 0x225   :  { %v1169_v49 = vadd.f32 %v3066_v1, %v1168_v7  ;;  %v2049_v8 = vpop.f32.mrb[105].mxu1  ;;  %2152 = vmatmul.mubr.f32.gmra.mrb[104].mxu0 %v1231_v3 }
 0x226   :  { %2154 = vmatprep.mubr.msk.f32.mxu0 %vm2252_vm0, %v2253_v4 }
 0x227   :  { %v1232_v11 = vmax.f32 %v1169_v49, 0.0 }
 0x228   :  { %v1173_v12 = vpop.f32.mrb[106].mxu1 }
 0x229   :  { %v1174_v15 = vadd.f32 %v3066_v1, %v1173_v12  ;;  %v2052_v5 = vpop.f32.mrb[107].mxu1  ;;  %2155 = vmatmul.mubr.f32.gmra.mrb[106].mxu0 %v1232_v11 }
 0x22a   :  { %2157 = vmatprep.mubr.msk.f32.mxu0 %vm2252_vm0, %v2253_v4 }
 0x22b   :  { %v1233_v41 = vmax.f32 %v1174_v15, 0.0 }
 0x22c   :  { %v1178_v19 = vpop.f32.mrb[108].mxu1 }
 0x22d   :  { %v1179_v16 = vadd.f32 %v3066_v1, %v1178_v19  ;;  %v2055_v6 = vpop.f32.mrb[109].mxu1  ;;  %2158 = vmatmul.mubr.f32.gmra.mrb[108].mxu0 %v1233_v41 }
 0x22e   :  { %2160 = vmatprep.mubr.msk.f32.mxu0 %vm2252_vm0, %v2253_v4 }
 0x22f   :  { %v1234_v20 = vmax.f32 %v1179_v16, 0.0 }
 0x230   :  { %v1183_v51 = vpop.f32.mrb[110].mxu1 }
 0x231   :  { %v1184_v21 = vadd.f32 %v3066_v1, %v1183_v51  ;;  %v2058_v22 = vpop.f32.mrb[111].mxu1  ;;  %2161 = vmatmul.mubr.f32.gmra.mrb[110].mxu0 %v1234_v20 }
 0x232   :  { %2163 = vmatprep.mubr.msk.f32.mxu0 %vm2252_vm0, %v2253_v4 }
 0x233   :  { %v1235_v23 = vmax.f32 %v1184_v21, 0.0 }
 0x234   :  { %v1188_v24 = vpop.f32.mrb[112].mxu1 }
 0x235   :  { %v1189_v48 = vadd.f32 %v3066_v1, %v1188_v24  ;;  %v2061_v10 = vpop.f32.mrb[113].mxu1  ;;  %2164 = vmatmul.mubr.f32.gmra.mrb[112].mxu0 %v1235_v23 }
 0x236   :  { %2166 = vmatprep.mubr.msk.f32.mxu0 %vm2252_vm0, %v2253_v4 }
 0x237   :  { %v1236_v9 = vmax.f32 %v1189_v48, 0.0 }
 0x238   :  { %v1193_v25 = vpop.f32.mrb[114].mxu1 }
 0x239   :  { %v1194_v26 = vadd.f32 %v3066_v1, %v1193_v25  ;;  %v2064_v29 = vpop.f32.mrb[115].mxu1  ;;  %2167 = vmatmul.mubr.f32.gmra.mrb[114].mxu0 %v1236_v9 }
 0x23a   :  { %2169 = vmatprep.mubr.msk.f32.mxu0 %vm2252_vm0, %v2253_v4 }
 0x23b   :  { %v1237_v30 = vmax.f32 %v1194_v26, 0.0 }
 0x23c   :  { %v1198_v31 = vpop.f32.mrb[116].mxu1 }
 0x23d   :  { %v1199_v32 = vadd.f32 %v3066_v1, %v1198_v31  ;;  %v2067_v14 = vpop.f32.mrb[117].mxu1  ;;  %2170 = vmatmul.mubr.f32.gmra.mrb[116].mxu0 %v1237_v30 }
 0x23e   :  { %2172 = vmatprep.mubr.msk.f32.mxu0 %vm2252_vm0, %v2253_v4 }
 0x23f   :  { %v1238_v61 = vmax.f32 %v1199_v32, 0.0 }
 0x240   :  { %v1203_v33 = vpop.f32.mrb[118].mxu1 }
 0x241   :  { %v1204_v13 = vadd.f32 %v3066_v1, %v1203_v33  ;;  %v2070_v36 = vpop.f32.mrb[119].mxu1  ;;  %2173 = vmatmul.mubr.f32.gmra.mrb[118].mxu0 %v1238_v61 }
 0x242   :  { %2175 = vmatprep.mubr.msk.f32.mxu0 %vm2252_vm0, %v2253_v4 }
 0x243   :  { %v1239_v37 = vmax.f32 %v1204_v13, 0.0 }
 0x244   :  { %v1208_v38 = vpop.f32.mrb[120].mxu1 }
 0x245   :  { %v1209_v55 = vadd.f32 %v3066_v1, %v1208_v38  ;;  %v2073_v18 = vpop.f32.mrb[121].mxu1  ;;  %2176 = vmatmul.mubr.f32.gmra.mrb[120].mxu0 %v1239_v37 }
 0x246   :  { %2178 = vmatprep.mubr.msk.f32.mxu0 %vm2252_vm0, %v2253_v4 }
 0x247   :  { %v1240_v39 = vmax.f32 %v1209_v55, 0.0 }
 0x248   :  { %v1213_v52 = vpop.f32.mrb[122].mxu1 }
 0x249   :  { %v1214_v40 = vadd.f32 %v3066_v1, %v1213_v52  ;;  %v2076_v43 = vpop.f32.mrb[123].mxu1  ;;  %2179 = vmatmul.mubr.f32.gmra.mrb[122].mxu0 %v1240_v39 }
 0x24a   :  { %2181 = vmatprep.mubr.msk.f32.mxu0 %vm2252_vm0, %v2253_v4 }
 0x24b   :  { %v1241_v17 = vmax.f32 %v1214_v40, 0.0 }
 0x24d   :  { %2182 = vmatmul.mubr.f32.gmra.mrb[124].mxu0 %v1241_v17 }
 0x2c0   :  { %v1331_v0 = vpop.f32.mrb[76].mxu0 }
 0x2c1   :  { %v1332_v28 = vadd.f32 %v3144_v44, %v1331_v0  ;;  %v2111_v45 = vpop.f32.mrb[77].mxu0 }
 0x2c3   :  { %1456 = vst.msk [vmem:[%s3282_s11] sm:$0xff] %vm1455_vm6, %v1332_v28 }
 0x2c4   :  { %v1336_v1 = vpop.f32.mrb[78].mxu0 }
 0x2c5   :  { %v1337_v4 = vadd.f32 %v3144_v44, %v1336_v1  ;;  %v2114_v59 = vpop.f32.mrb[79].mxu0 }
 0x2c7   :  { %1457 = vst.msk [vmem:[%s3282_s11 + $0x8] sm:$0xff] %vm1455_vm6, %v1337_v4 }
 0x2c8   :  { %v1341_v56 = vpop.f32.mrb[80].mxu0 }
 0x2c9   :  { %v1342_v46 = vadd.f32 %v3144_v44, %v1341_v56  ;;  %v2117_v47 = vpop.f32.mrb[81].mxu0 }
 0x2cb   :  { %1458 = vst.msk [vmem:[%s3282_s11 + $0x10] sm:$0xff] %vm1455_vm6, %v1342_v46 }
 0x2cc   :  { %v1346_v50 = vpop.f32.mrb[82].mxu0 }
 0x2cd   :  { %v1347_v27 = vadd.f32 %v3144_v44, %v1346_v50  ;;  %v2120_v35 = vpop.f32.mrb[83].mxu0 }
 0x2cf   :  { %1459 = vst.msk [vmem:[%s3282_s11 + $0x18] sm:$0xff] %vm1455_vm6, %v1347_v27 }
 0x2d0   :  { %v1351_v53 = vpop.f32.mrb[84].mxu0 }
 0x2d1   :  { %v1352_v54 = vadd.f32 %v3144_v44, %v1351_v53  ;;  %v2123_v57 = vpop.f32.mrb[85].mxu0 }
 0x2d3   :  { %1460 = vst.msk [vmem:[%s3282_s11 + $0x20] sm:$0xff] %vm1455_vm6, %v1352_v54 }
 0x2d4   :  { %v1356_v60 = vpop.f32.mrb[86].mxu0 }
 0x2d5   :  { %v1357_v58 = vadd.f32 %v3144_v44, %v1356_v60  ;;  %v2126_v62 = vpop.f32.mrb[87].mxu0 }
 0x2d7   :  { %1461 = vst.msk [vmem:[%s3282_s11 + $0x28] sm:$0xff] %vm1455_vm6, %v1357_v58 }
 0x2d8   :  { %v1361_v63 = vpop.f32.mrb[88].mxu0 }
 0x2d9   :  { %v1362_v42 = vadd.f32 %v3144_v44, %v1361_v63  ;;  %v2129_v2 = vpop.f32.mrb[89].mxu0 }
 0x2db   :  { %1462 = vst.msk [vmem:[%s3282_s11 + $0x30] sm:$0xff] %vm1455_vm6, %v1362_v42 }
 0x2dc   :  { %v1366_v34 = vpop.f32.mrb[90].mxu0 }
 0x2dd   :  { %v1367_v3 = vadd.f32 %v3144_v44, %v1366_v34  ;;  %v2132_v7 = vpop.f32.mrb[91].mxu0 }
 0x2df   :  { %1463 = vst.msk [vmem:[%s3282_s11 + $0x38] sm:$0xff] %vm1455_vm6, %v1367_v3 }
 0x2e0   :  { %v1371_v49 = vpop.f32.mrb[92].mxu0 }
 0x2e1   :  { %v1372_v8 = vadd.f32 %v3144_v44, %v1371_v49  ;;  %v2135_v11 = vpop.f32.mrb[93].mxu0 }
 0x2e3   :  { %1464 = vst.msk [vmem:[%s3282_s11 + $0x40] sm:$0xff] %vm1455_vm6, %v1372_v8 }
 0x2e4   :  { %v1376_v12 = vpop.f32.mrb[94].mxu0 }
 0x2e5   :  { %v1377_v15 = vadd.f32 %v3144_v44, %v1376_v12  ;;  %v2138_v5 = vpop.f32.mrb[95].mxu0 }
 0x2e7   :  { %1465 = vst.msk [vmem:[%s3282_s11 + $0x48] sm:$0xff] %vm1455_vm6, %v1377_v15 }
 0x2e8   :  { %v1381_v41 = vpop.f32.mrb[96].mxu0 }
 0x2e9   :  { %v1382_v19 = vadd.f32 %v3144_v44, %v1381_v41  ;;  %v2141_v16 = vpop.f32.mrb[97].mxu0 }
 0x2eb   :  { %1466 = vst.msk [vmem:[%s3282_s11 + $0x50] sm:$0xff] %vm1455_vm6, %v1382_v19 }
 0x2ec   :  { %v1386_v6 = vpop.f32.mrb[98].mxu0 }
 0x2ed   :  { %v1387_v20 = vadd.f32 %v3144_v44, %v1386_v6  ;;  %v2144_v51 = vpop.f32.mrb[99].mxu0 }
 0x2ef   :  { %1467 = vst.msk [vmem:[%s3282_s11 + $0x58] sm:$0xff] %vm1455_vm6, %v1387_v20 }
 0x2f0   :  { %v1391_v21 = vpop.f32.mrb[100].mxu0 }
 0x2f1   :  { %v1392_v22 = vadd.f32 %v3144_v44, %v1391_v21  ;;  %v2147_v23 = vpop.f32.mrb[101].mxu0 }
 0x2f3   :  { %1468 = vst.msk [vmem:[%s3282_s11 + $0x60] sm:$0xff] %vm1455_vm6, %v1392_v22 }
 0x2f4   :  { %v1396_v24 = vpop.f32.mrb[102].mxu0 }
 0x2f5   :  { %v1397_v48 = vadd.f32 %v3144_v44, %v1396_v24  ;;  %v2150_v10 = vpop.f32.mrb[103].mxu0 }
 0x2f7   :  { %1469 = vst.msk [vmem:[%s3282_s11 + $0x68] sm:$0xff] %vm1455_vm6, %v1397_v48 }
 0x2f8   :  { %v1401_v9 = vpop.f32.mrb[104].mxu0 }
 0x2f9   :  { %v1402_v25 = vadd.f32 %v3144_v44, %v1401_v9  ;;  %v2153_v26 = vpop.f32.mrb[105].mxu0 }
 0x2fb   :  { %1470 = vst.msk [vmem:[%s3282_s11 + $0x70] sm:$0xff] %vm1455_vm6, %v1402_v25 }
 0x2fc   :  { %v1406_v29 = vpop.f32.mrb[106].mxu0 }
 0x2fd   :  { %v1407_v30 = vadd.f32 %v3144_v44, %v1406_v29  ;;  %v2156_v31 = vpop.f32.mrb[107].mxu0 }
 0x2ff   :  { %1471 = vst.msk [vmem:[%s3282_s11 + $0x78] sm:$0xff] %vm1455_vm6, %v1407_v30 }
 0x300   :  { %v1411_v32 = vpop.f32.mrb[108].mxu0 }
 0x301   :  { %v1412_v14 = vadd.f32 %v3144_v44, %v1411_v32  ;;  %v2159_v61 = vpop.f32.mrb[109].mxu0 }
 0x303   :  { %1472 = vst.msk [vmem:[%s3282_s11 + $0x80] sm:$0xff] %vm1455_vm6, %v1412_v14 }
 0x304   :  { %v1416_v33 = vpop.f32.mrb[110].mxu0 }
 0x305   :  { %v1417_v13 = vadd.f32 %v3144_v44, %v1416_v33  ;;  %v2162_v36 = vpop.f32.mrb[111].mxu0 }
 0x307   :  { %1473 = vst.msk [vmem:[%s3282_s11 + $0x88] sm:$0xff] %vm1455_vm6, %v1417_v13 }
 0x308   :  { %v1421_v37 = vpop.f32.mrb[112].mxu0 }
 0x309   :  { %v1422_v38 = vadd.f32 %v3144_v44, %v1421_v37  ;;  %v2165_v55 = vpop.f32.mrb[113].mxu0 }
 0x30b   :  { %1474 = vst.msk [vmem:[%s3282_s11 + $0x90] sm:$0xff] %vm1455_vm6, %v1422_v38 }
 0x30c   :  { %v1426_v18 = vpop.f32.mrb[114].mxu0 }
 0x30d   :  { %v1427_v39 = vadd.f32 %v3144_v44, %v1426_v18  ;;  %v2168_v52 = vpop.f32.mrb[115].mxu0 }
 0x30f   :  { %1475 = vst.msk [vmem:[%s3282_s11 + $0x98] sm:$0xff] %vm1455_vm6, %v1427_v39 }
 0x310   :  { %v1431_v40 = vpop.f32.mrb[116].mxu0 }
 0x311   :  { %v1432_v43 = vadd.f32 %v3144_v44, %v1431_v40  ;;  %v2171_v17 = vpop.f32.mrb[117].mxu0 }
 0x313   :  { %1476 = vst.msk [vmem:[%s3282_s11 + $0xa0] sm:$0xff] %vm1455_vm6, %v1432_v43 }
 0x314   :  { %v1436_v0 = vpop.f32.mrb[118].mxu0 }
 0x315   :  { %v1437_v28 = vadd.f32 %v3144_v44, %v1436_v0  ;;  %v2174_v45 = vpop.f32.mrb[119].mxu0 }
 0x317   :  { %1477 = vst.msk [vmem:[%s3282_s11 + $0xa8] sm:$0xff] %vm1455_vm6, %v1437_v28 }
 0x318   :  { %v1441_v1 = vpop.f32.mrb[120].mxu0 }
 0x319   :  { %v1442_v4 = vadd.f32 %v3144_v44, %v1441_v1  ;;  %v2177_v59 = vpop.f32.mrb[121].mxu0 }
 0x31b   :  { %1478 = vst.msk [vmem:[%s3282_s11 + $0xb0] sm:$0xff] %vm1455_vm6, %v1442_v4 }
 0x31c   :  { %v1446_v56 = vpop.f32.mrb[122].mxu0 }
 0x31d   :  { %v1447_v46 = vadd.f32 %v3144_v44, %v1446_v56  ;;  %v2180_v47 = vpop.f32.mrb[123].mxu0 }
 0x31f   :  { %1479 = vst.msk [vmem:[%s3282_s11 + $0xb8] sm:$0xff] %vm1455_vm6, %v1447_v46 }
 0x320   :  { %v1451_v50 = vpop.f32.mrb[124].mxu0 }
 0x321   :  { %v1452_v27 = vadd.f32 %v3144_v44, %v1451_v50  ;;  %v2183_v35 = vpop.f32.mrb[125].mxu0 }
 0x323   :  { %1480 = vst.msk [vmem:[%s3282_s11 + $0xc0] sm:$0xff] %vm1455_vm6, %v1452_v27 }

</bundles_post_ra>
